<compile_context>
chip_gen: v6e
topology: v6e:2x2x1
jax: 0.10.0
libtpu: 0.0.40
codegen_flags: <defaults>
</compile_context>

<pallas_src>
import jax
import jax.numpy as jnp
from jax.experimental import pallas as pl
from jax.experimental.pallas import tpu as pltpu

# ---------------- configuration (small synthetic shapes) ----------------
B = 2                      # batch
C_IN = 3                   # image channels
IMG = 32                   # H = W
BLOCK_SIZE = 16            # MAE block / ViT patch size
N_PATCH = (IMG // BLOCK_SIZE) ** 2           # 4 tokens
PATCH_DIM = C_IN * BLOCK_SIZE * BLOCK_SIZE   # 768
D = 32                     # hidden dim
NUM_CLASSES = 10
MASK_RATIO = 0.5
HOG_RATIO = 1.0
N_FORWARD = 10
HOG_POOL = 4
HOG_NBINS = 9
_FEAT = IMG // BLOCK_SIZE                    # 2
_U = (IMG // HOG_POOL) // _FEAT              # 4
HOG_DIM = C_IN * HOG_NBINS * _U * _U         # 432

HEAD_PAD = 128             # lane-dense classifier head width (slice back to 10)
HOG_PAD = 512              # lane-dense HOG head width (slice back to 432)


# ---------------- fused ViT-stub forward kernel ----------------
def _fused_vit_kernel(patch_ref, mask_ref,
                      w_embed_ref, b_embed_ref, mask_tok_ref, cls_ref,
                      w1_ref, b1_ref, ln_g_ref, ln_b_ref,
                      w_head_ref, b_head_ref, w_proj_ref, b_proj_ref,
                      logits_ref, tok_ref, hog_ref):
    bt, n, pdim = patch_ref.shape
    d = w_embed_ref.shape[1]

    def layernorm(h):
        mu = jnp.mean(h, axis=-1, keepdims=True)
        var = jnp.mean((h - mu) ** 2, axis=-1, keepdims=True)
        return (h - mu) * jax.lax.rsqrt(var + 1e-5) * ln_g_ref[...] + ln_b_ref[...]

    def mlp_block(h2d):
        # TODO(synk): PyTorch nn.GELU defaults to exact erf; tanh-approx used here
        # (EUP-friendly, matches prior accepted version).
        y = jnp.dot(h2d, w1_ref[...], preferred_element_type=jnp.float32) + b1_ref[...]
        return layernorm(jax.nn.gelu(y, approximate=True))

    # ---- patch embedding (K=768 matmul on the MXU) ----
    x2d = patch_ref[...].reshape(bt * n, pdim)
    tok = jnp.dot(x2d, w_embed_ref[...], preferred_element_type=jnp.float32) + b_embed_ref[...]
    tok = tok.reshape(bt, n, d)

    # ---- mask-token substitution (mask==0 leaves tokens unchanged) ----
    m = mask_ref[...]                                            # (bt, n, 1)
    tok = m * mask_tok_ref[...].reshape(1, 1, d) + (1.0 - m) * tok

    # ---- token path: GELU MLP + layernorm -> norm tokens + HOG head ----
    norm_tok = mlp_block(tok.reshape(bt * n, d))                 # (bt*n, d)
    tok_ref[...] = norm_tok.reshape(bt, n, d)
    hog = jnp.dot(norm_tok, w_proj_ref[...],
                  preferred_element_type=jnp.float32) + b_proj_ref[...]
    hog_ref[...] = hog.reshape(bt, n, -1)                        # lane-dense 512

    # ---- cls-token path -> classifier head (lane-dense 128) ----
    cls = jnp.broadcast_to(cls_ref[...], (bt, d))
    norm_cls = mlp_block(cls)
    logits = jnp.dot(norm_cls, w_head_ref[...],
                     preferred_element_type=jnp.float32) + b_head_ref[...]
    logits_ref[...] = logits.reshape(bt, 1, -1)


def fused_forward(params, patches, mask):
    """One fused launch: patches (Bt, N, PATCH_DIM), mask (Bt, N) float.
    Returns (logits (Bt, NUM_CLASSES), norm tokens (Bt, N, D), hog preds (Bt, N, HOG_DIM))."""
    btot = patches.shape[0]
    bt = 1
    for cand in (8, 4, 2, 1):
        if btot % cand == 0:
            bt = cand
            break
    grid = (btot // bt,)
    mask3 = mask.reshape(btot, N_PATCH, 1).astype(jnp.float32)

    weights = (params["w_embed"], params["b_embed"], params["mask_token"],
               params["cls_token"], params["w1"], params["b1"],
               params["ln_g"], params["ln_b"],
               params["w_head_pad"], params["b_head_pad"],
               params["w_proj_pad"], params["b_proj_pad"])
    # Weights use constant index_maps: resident in VMEM, not re-DMAed per grid step.
    w_specs = [pl.BlockSpec(w.shape, lambda i: (0, 0)) for w in weights]

    logits, tok_norm, hog = pl.pallas_call(
        _fused_vit_kernel,
        grid=grid,
        in_specs=[pl.BlockSpec((bt, N_PATCH, PATCH_DIM), lambda i: (i, 0, 0)),
                  pl.BlockSpec((bt, N_PATCH, 1), lambda i: (i, 0, 0))] + w_specs,
        out_specs=(pl.BlockSpec((bt, 1, HEAD_PAD), lambda i: (i, 0, 0)),
                   pl.BlockSpec((bt, N_PATCH, D), lambda i: (i, 0, 0)),
                   pl.BlockSpec((bt, N_PATCH, HOG_PAD), lambda i: (i, 0, 0))),
        out_shape=(jax.ShapeDtypeStruct((btot, 1, HEAD_PAD), jnp.float32),
                   jax.ShapeDtypeStruct((btot, N_PATCH, D), jnp.float32),
                   jax.ShapeDtypeStruct((btot, N_PATCH, HOG_PAD), jnp.float32)),
        compiler_params=pltpu.CompilerParams(
            dimension_semantics=("parallel",),
            vmem_limit_bytes=16 * 1024 * 1024),
    )(patches, mask3, *weights)

    return (logits[:, 0, :NUM_CLASSES], tok_norm, hog[:, :, :HOG_DIM])


# ---------------- deterministic synthetic model params ----------------
def init_params(key):
    keys = jax.random.split(key, 6)
    s = 0.02
    w_head = s * jax.random.normal(keys[3], (D, NUM_CLASSES), jnp.float32)
    w_proj = s * jax.random.normal(keys[5], (D, HOG_DIM), jnp.float32)
    return {
        "w_embed": s * jax.random.normal(keys[0], (PATCH_DIM, D), jnp.float32),
        "b_embed": jnp.zeros((1, D), jnp.float32),
        "cls_token": s * jax.random.normal(keys[1], (1, D), jnp.float32),
        "w1": s * jax.random.normal(keys[2], (D, D), jnp.float32),
        "b1": jnp.zeros((1, D), jnp.float32),
        "ln_g": jnp.ones((1, D), jnp.float32),
        "ln_b": jnp.zeros((1, D), jnp.float32),
        "mask_token": s * jax.random.normal(keys[4], (1, D), jnp.float32),
        # lane-dense (multiple-of-128) padded heads; pad columns are exact zeros
        "w_head_pad": jnp.zeros((D, HEAD_PAD), jnp.float32).at[:, :NUM_CLASSES].set(w_head),
        "b_head_pad": jnp.zeros((1, HEAD_PAD), jnp.float32),
        "w_proj_pad": jnp.zeros((D, HOG_PAD), jnp.float32).at[:, :HOG_DIM].set(w_proj),
        "b_proj_pad": jnp.zeros((1, HOG_PAD), jnp.float32),
    }


# ---------------- plain-JAX glue (one-shot / sub-overhead-floor ops) ----------------
def patchify(x):
    b, c, h, w = x.shape
    p = BLOCK_SIZE
    x = x.reshape(b, c, h // p, p, w // p, p)
    x = jnp.transpose(x, (0, 2, 4, 1, 3, 5))        # (B, gh, gw, C, p, p)
    return x.reshape(b, (h // p) * (w // p), c * p * p)


def hogs_stub(x):
    # TODO(synk): original `hogs` is an externally supplied HOG layer; this is a
    # deterministic gradient-orientation-histogram proxy (plain JAX, runs once).
    gx = jnp.roll(x, -1, axis=3) - jnp.roll(x, 1, axis=3)
    gy = jnp.roll(x, -1, axis=2) - jnp.roll(x, 1, axis=2)
    mag = jnp.sqrt(gx * gx + gy * gy + 1e-12)
    ang = jnp.arctan2(gy, gx)
    bins = jnp.mod(jnp.floor((ang + jnp.pi) / (2.0 * jnp.pi) * HOG_NBINS),
                   HOG_NBINS).astype(jnp.int32)
    oh = jax.nn.one_hot(bins, HOG_NBINS, dtype=jnp.float32)         # (B,C,H,W,nb)
    hist = jnp.transpose(oh * mag[..., None], (0, 1, 4, 2, 3))      # (B,C,nb,H,W)
    b, c, nb, h, w = hist.shape
    hist = hist.reshape(b, c, nb, h // HOG_POOL, HOG_POOL,
                        w // HOG_POOL, HOG_POOL).mean(axis=(4, 6))
    return hist                                                     # (B,C,nb,Hh,Wh)


def get_hog_label_2d(x):
    # mirrors _get_hog_label_2d but returns the full (B, N, hog_dim) grid;
    # masked selection is folded into the masked-MSE reduction.
    hog = hogs_stub(x)
    b = hog.shape[0]
    hog = hog.reshape(b, hog.shape[1] * hog.shape[2], hog.shape[3], hog.shape[4])
    hh = hog.shape[-1]
    u = hh // _FEAT
    t = jnp.transpose(hog, (0, 2, 3, 1))                            # (B,Hh,Wh,C*)
    t = t.reshape(b, _FEAT, u, _FEAT, u, t.shape[-1])
    t = jnp.transpose(t, (0, 1, 3, 5, 2, 4))                        # (B,f,f,C*,u,u)
    return t.reshape(b, _FEAT * _FEAT, -1)                          # (B,N,hog_dim)


def tta_transform(x, key):
    # TODO(synk): PIL/torchvision TTA pipeline (color jitter / affine / blur) replaced
    # by a deterministic Gaussian-noise + clip proxy.
    return jnp.clip(x + 0.005 * jax.random.normal(key, x.shape, jnp.float32), 0.0, 1.0)


def softmax_entropy(x, x_ema):
    # -(x_ema.softmax(1) * x.log_softmax(1)).sum(1)
    return -jnp.sum(jax.nn.softmax(x_ema, axis=1) * jax.nn.log_softmax(x, axis=1), axis=1)


def masked_mse(preds, labels, mask):
    # MSELoss over boolean-indexed (masked) token rows; guarded against empty mask.
    d2 = mask[:, :, None] * (preds - labels) ** 2
    cnt = jnp.maximum(jnp.sum(mask), 1.0) * preds.shape[-1]
    return jnp.sum(d2) / cnt


# ---------------- Continual_MAE forward (one adaptation step, forward-only) -------
def continual_mae_forward(params, x, base_key):
    b = x.shape[0]

    # ---- N_FORWARD stochastic forwards through model_temp, batched into ONE launch ----
    keys = jax.random.split(base_key, N_FORWARD)
    x_aug = jax.vmap(lambda k: tta_transform(x, k))(keys)           # (F,B,C,H,W)
    x_aug = x_aug.reshape(N_FORWARD * b, C_IN, IMG, IMG)
    patches_aug = patchify(x_aug)                                   # (F*B, N, PD)
    zero_mask = jnp.zeros((N_FORWARD * b, N_PATCH), jnp.float32)
    _, tok_norm_aug, _ = fused_forward(params, patches_aug, zero_mask)
    n_outputs = jnp.mean(tok_norm_aug, axis=-1).reshape(N_FORWARD, b, N_PATCH)
    var = jnp.var(n_outputs, axis=0, ddof=1)                        # unbiased, (B, N)

    # ---- top-k highest-variance tokens get masked ----
    top_k = int(N_PATCH * MASK_RATIO)
    order = jnp.argsort(-var, axis=1)
    masked_indices = order[:, :top_k]
    mask_chosed = jnp.zeros_like(var).at[
        jnp.arange(b)[:, None], masked_indices].set(1.0)

    # ---- masked forward (adapted model) + unmasked temp forward in one launch ----
    patches_x = patchify(x)
    patches_both = jnp.concatenate([patches_x, patches_x], axis=0)  # (2B, N, PD)
    mask_both = jnp.concatenate([mask_chosed, jnp.zeros_like(mask_chosed)], axis=0)
    logits_both, _, hog_both = fused_forward(params, patches_both, mask_both)
    outputs = logits_both[:b]
    outputs_temp = logits_both[b:]
    hog_preds = hog_both[:b]                                        # (B, N, HOG_DIM)

    # ---- HOG reconstruction loss on masked tokens ----
    hog_labels = get_hog_label_2d(x)
    hog_loss = masked_mse(hog_preds, hog_labels, mask_chosed)

    # ---- entropy between adapted-model logits and temp-model logits ----
    loss_ori = jnp.mean(softmax_entropy(outputs, outputs_temp))
    loss = loss_ori + HOG_RATIO * hog_loss
    # TODO(synk): loss.backward(), optimizer.step()/zero_grad(), stochastic weight
    # restore and model_temp<-model parameter copies are mutable training-side
    # effects with no forward-pass Pallas equivalent; omitted.
    return outputs_temp, loss_ori, hog_loss, loss


if __name__ == "__main__":
    key = jax.random.PRNGKey(0)
    pkey, xkey, tkey = jax.random.split(key, 3)
    params = init_params(pkey)
    x = jax.random.uniform(xkey, (B, C_IN, IMG, IMG), jnp.float32)

    fwd = jax.jit(continual_mae_forward)
    outputs_temp, loss_ori, hog_loss, loss = fwd(params, x, tkey)
    jax.block_until_ready((outputs_temp, loss_ori, hog_loss, loss))

    assert outputs_temp.shape == (B, NUM_CLASSES)
    assert bool(jnp.isfinite(loss)) and bool(jnp.all(jnp.isfinite(outputs_temp)))
    print("KERNEL_OK")
</pallas_src>

<mosaic_0001>
module attributes {stable_mosaic.version = 11 : i64} {
  func.func @_fused_vit_kernel(%arg0: i32, %arg1: memref<4x4x768xf32, #tpu.memory_space<vmem>>, %arg2: memref<4x4x1xf32, #tpu.memory_space<vmem>>, %arg3: memref<768x32xf32, #tpu.memory_space<vmem>>, %arg4: memref<1x32xf32, #tpu.memory_space<vmem>>, %arg5: memref<1x32xf32, #tpu.memory_space<vmem>>, %arg6: memref<1x32xf32, #tpu.memory_space<vmem>>, %arg7: memref<32x32xf32, #tpu.memory_space<vmem>>, %arg8: memref<1x32xf32, #tpu.memory_space<vmem>>, %arg9: memref<1x32xf32, #tpu.memory_space<vmem>>, %arg10: memref<1x32xf32, #tpu.memory_space<vmem>>, %arg11: memref<32x128xf32, #tpu.memory_space<vmem>>, %arg12: memref<1x128xf32, #tpu.memory_space<vmem>>, %arg13: memref<32x512xf32, #tpu.memory_space<vmem>>, %arg14: memref<1x512xf32, #tpu.memory_space<vmem>>, %arg15: memref<4x1x128xf32, #tpu.memory_space<vmem>>, %arg16: memref<4x4x32xf32, #tpu.memory_space<vmem>>, %arg17: memref<4x4x512xf32, #tpu.memory_space<vmem>>) attributes {dimension_semantics = [#tpu.dimension_semantics<parallel>], iteration_bounds = array<i64: 5>, scalar_prefetch = 0 : i64, scratch_operands = 0 : i64, tpu.core_type = #tpu.core_type<tc>, window_params = [{transform_indices = @transform_0, window_bounds = array<i64: 4, 4, 768>}, {transform_indices = @transform_1, window_bounds = array<i64: 4, 4, 1>}, {pipeline_mode = #tpu.pipeline_mode<synchronous>, transform_indices = @transform_2, window_bounds = array<i64: 768, 32>}, {pipeline_mode = #tpu.pipeline_mode<synchronous>, transform_indices = @transform_3, window_bounds = array<i64: 1, 32>}, {pipeline_mode = #tpu.pipeline_mode<synchronous>, transform_indices = @transform_4, window_bounds = array<i64: 1, 32>}, {pipeline_mode = #tpu.pipeline_mode<synchronous>, transform_indices = @transform_5, window_bounds = array<i64: 1, 32>}, {pipeline_mode = #tpu.pipeline_mode<synchronous>, transform_indices = @transform_6, window_bounds = array<i64: 32, 32>}, {pipeline_mode = #tpu.pipeline_mode<synchronous>, transform_indices = @transform_7, window_bounds = array<i64: 1, 32>}, {pipeline_mode = #tpu.pipeline_mode<synchronous>, transform_indices = @transform_8, window_bounds = array<i64: 1, 32>}, {pipeline_mode = #tpu.pipeline_mode<synchronous>, transform_indices = @transform_9, window_bounds = array<i64: 1, 32>}, {pipeline_mode = #tpu.pipeline_mode<synchronous>, transform_indices = @transform_10, window_bounds = array<i64: 32, 128>}, {pipeline_mode = #tpu.pipeline_mode<synchronous>, transform_indices = @transform_11, window_bounds = array<i64: 1, 128>}, {pipeline_mode = #tpu.pipeline_mode<synchronous>, transform_indices = @transform_12, window_bounds = array<i64: 32, 512>}, {pipeline_mode = #tpu.pipeline_mode<synchronous>, transform_indices = @transform_13, window_bounds = array<i64: 1, 512>}, {transform_indices = @transform_14, window_bounds = array<i64: 4, 1, 128>}, {transform_indices = @transform_15, window_bounds = array<i64: 4, 4, 32>}, {transform_indices = @transform_16, window_bounds = array<i64: 4, 4, 512>}]} {
    %c0 = arith.constant 0 : index
    %c0_0 = arith.constant 0 : index
    %c0_1 = arith.constant 0 : index
    %0 = vector.load %arg1[%c0, %c0_0, %c0_1] : memref<4x4x768xf32, #tpu.memory_space<vmem>>, vector<4x4x768xf32>
    %1 = vector.shape_cast %0 : vector<4x4x768xf32> to vector<16x768xf32>
    %c0_2 = arith.constant 0 : index
    %c0_3 = arith.constant 0 : index
    %2 = vector.load %arg3[%c0_2, %c0_3] : memref<768x32xf32, #tpu.memory_space<vmem>>, vector<768x32xf32>
    %cst = arith.constant dense<0.000000e+00> : vector<16x32xf32>
    %3 = tpu.matmul %1, %2, %cst {dimension_numbers = #tpu.dot_dimension_numbers<[1], [0], [0], [1], [0, 0, 1, 1], [], []>} : vector<16x768xf32>, vector<768x32xf32>, vector<16x32xf32> -> vector<16x32xf32>
    %c0_4 = arith.constant 0 : index
    %c0_5 = arith.constant 0 : index
    %4 = vector.load %arg4[%c0_4, %c0_5] : memref<1x32xf32, #tpu.memory_space<vmem>>, vector<1x32xf32>
    %5 = vector.broadcast %4 : vector<1x32xf32> to vector<16x32xf32>
    %6 = arith.addf %3, %5 : vector<16x32xf32>
    %7 = vector.shape_cast %6 : vector<16x32xf32> to vector<4x4x32xf32>
    %c0_6 = arith.constant 0 : index
    %c0_7 = arith.constant 0 : index
    %c0_8 = arith.constant 0 : index
    %8 = vector.load %arg2[%c0_6, %c0_7, %c0_8] : memref<4x4x1xf32, #tpu.memory_space<vmem>>, vector<4x4x1xf32>
    %c0_9 = arith.constant 0 : index
    %c0_10 = arith.constant 0 : index
    %9 = vector.load %arg5[%c0_9, %c0_10] : memref<1x32xf32, #tpu.memory_space<vmem>>, vector<1x32xf32>
    %10 = vector.shape_cast %9 : vector<1x32xf32> to vector<1x1x32xf32>
    %11 = vector.broadcast %8 : vector<4x4x1xf32> to vector<4x4x32xf32>
    %12 = vector.broadcast %10 : vector<1x1x32xf32> to vector<4x4x32xf32>
    %13 = arith.mulf %11, %12 : vector<4x4x32xf32>
    %cst_11 = arith.constant 1.000000e+00 : f32
    %14 = vector.broadcast %cst_11 : f32 to vector<4x4x1xf32>
    %15 = arith.subf %14, %8 : vector<4x4x1xf32>
    %16 = vector.broadcast %15 : vector<4x4x1xf32> to vector<4x4x32xf32>
    %17 = arith.mulf %16, %7 : vector<4x4x32xf32>
    %18 = arith.addf %13, %17 : vector<4x4x32xf32>
    %19 = vector.shape_cast %18 : vector<4x4x32xf32> to vector<16x32xf32>
    %c0_12 = arith.constant 0 : index
    %c0_13 = arith.constant 0 : index
    %20 = vector.load %arg7[%c0_12, %c0_13] : memref<32x32xf32, #tpu.memory_space<vmem>>, vector<32x32xf32>
    %cst_14 = arith.constant dense<0.000000e+00> : vector<16x32xf32>
    %21 = tpu.matmul %19, %20, %cst_14 {dimension_numbers = #tpu.dot_dimension_numbers<[1], [0], [0], [1], [0, 0, 1, 1], [], []>} : vector<16x32xf32>, vector<32x32xf32>, vector<16x32xf32> -> vector<16x32xf32>
    %c0_15 = arith.constant 0 : index
    %c0_16 = arith.constant 0 : index
    %22 = vector.load %arg8[%c0_15, %c0_16] : memref<1x32xf32, #tpu.memory_space<vmem>>, vector<1x32xf32>
    %23 = vector.broadcast %22 : vector<1x32xf32> to vector<16x32xf32>
    %24 = arith.addf %21, %23 : vector<16x32xf32>
    %25 = arith.mulf %24, %24 : vector<16x32xf32>
    %26 = arith.mulf %24, %25 : vector<16x32xf32>
    %cst_17 = arith.constant 4.471500e-02 : f32
    %27 = vector.broadcast %cst_17 : f32 to vector<16x32xf32>
    %28 = arith.mulf %27, %26 : vector<16x32xf32>
    %29 = arith.addf %24, %28 : vector<16x32xf32>
    %cst_18 = arith.constant 0.797884583 : f32
    %30 = vector.broadcast %cst_18 : f32 to vector<16x32xf32>
    %31 = arith.mulf %30, %29 : vector<16x32xf32>
    %32 = math.tanh %31 : vector<16x32xf32>
    %cst_19 = arith.constant 1.000000e+00 : f32
    %33 = vector.broadcast %cst_19 : f32 to vector<16x32xf32>
    %34 = arith.addf %33, %32 : vector<16x32xf32>
    %cst_20 = arith.constant 5.000000e-01 : f32
    %35 = vector.broadcast %cst_20 : f32 to vector<16x32xf32>
    %36 = arith.mulf %35, %34 : vector<16x32xf32>
    %37 = arith.mulf %24, %36 : vector<16x32xf32>
    %cst_21 = arith.constant dense<0.000000e+00> : vector<16xf32>
    %38 = vector.multi_reduction <add>, %37, %cst_21 [1] : vector<16x32xf32> to vector<16xf32>
    %39 = vector.shape_cast %38 : vector<16xf32> to vector<16x1xf32>
    %cst_22 = arith.constant 3.200000e+01 : f32
    %40 = vector.broadcast %cst_22 : f32 to vector<16x1xf32>
    %41 = arith.divf %39, %40 : vector<16x1xf32>
    %42 = vector.broadcast %41 : vector<16x1xf32> to vector<16x32xf32>
    %43 = arith.subf %37, %42 : vector<16x32xf32>
    %44 = arith.mulf %43, %43 : vector<16x32xf32>
    %cst_23 = arith.constant dense<0.000000e+00> : vector<16xf32>
    %45 = vector.multi_reduction <add>, %44, %cst_23 [1] : vector<16x32xf32> to vector<16xf32>
    %46 = vector.shape_cast %45 : vector<16xf32> to vector<16x1xf32>
    %cst_24 = arith.constant 3.200000e+01 : f32
    %47 = vector.broadcast %cst_24 : f32 to vector<16x1xf32>
    %48 = arith.divf %46, %47 : vector<16x1xf32>
    %49 = vector.broadcast %41 : vector<16x1xf32> to vector<16x32xf32>
    %50 = arith.subf %37, %49 : vector<16x32xf32>
    %cst_25 = arith.constant 9.99999974E-6 : f32
    %51 = vector.broadcast %cst_25 : f32 to vector<16x1xf32>
    %52 = arith.addf %48, %51 : vector<16x1xf32>
    %53 = math.rsqrt %52 : vector<16x1xf32>
    %54 = vector.broadcast %53 : vector<16x1xf32> to vector<16x32xf32>
    %55 = arith.mulf %50, %54 : vector<16x32xf32>
    %c0_26 = arith.constant 0 : index
    %c0_27 = arith.constant 0 : index
    %56 = vector.load %arg9[%c0_26, %c0_27] : memref<1x32xf32, #tpu.memory_space<vmem>>, vector<1x32xf32>
    %57 = vector.broadcast %56 : vector<1x32xf32> to vector<16x32xf32>
    %58 = arith.mulf %55, %57 : vector<16x32xf32>
    %c0_28 = arith.constant 0 : index
    %c0_29 = arith.constant 0 : index
    %59 = vector.load %arg10[%c0_28, %c0_29] : memref<1x32xf32, #tpu.memory_space<vmem>>, vector<1x32xf32>
    %60 = vector.broadcast %59 : vector<1x32xf32> to vector<16x32xf32>
    %61 = arith.addf %58, %60 : vector<16x32xf32>
    %62 = vector.shape_cast %61 : vector<16x32xf32> to vector<4x4x32xf32>
    %c0_30 = arith.constant 0 : index
    %c0_31 = arith.constant 0 : index
    %c0_32 = arith.constant 0 : index
    %63 = vector.load %arg16[%c0_30, %c0_31, %c0_32] : memref<4x4x32xf32, #tpu.memory_space<vmem>>, vector<4x4x32xf32>
    tpu.vector_store %arg16[%c0_30, %c0_31, %c0_32], %62 {strides = array<i32>} : memref<4x4x32xf32, #tpu.memory_space<vmem>>, vector<4x4x32xf32>,
    %c0_33 = arith.constant 0 : index
    %c0_34 = arith.constant 0 : index
    %64 = vector.load %arg13[%c0_33, %c0_34] : memref<32x512xf32, #tpu.memory_space<vmem>>, vector<32x512xf32>
    %cst_35 = arith.constant dense<0.000000e+00> : vector<16x512xf32>
    %65 = tpu.matmul %61, %64, %cst_35 {dimension_numbers = #tpu.dot_dimension_numbers<[1], [0], [0], [1], [0, 0, 1, 1], [], []>} : vector<16x32xf32>, vector<32x512xf32>, vector<16x512xf32> -> vector<16x512xf32>
    %c0_36 = arith.constant 0 : index
    %c0_37 = arith.constant 0 : index
    %66 = vector.load %arg14[%c0_36, %c0_37] : memref<1x512xf32, #tpu.memory_space<vmem>>, vector<1x512xf32>
    %67 = vector.broadcast %66 : vector<1x512xf32> to vector<16x512xf32>
    %68 = arith.addf %65, %67 : vector<16x512xf32>
    %69 = vector.shape_cast %68 : vector<16x512xf32> to vector<4x4x512xf32>
    %c0_38 = arith.constant 0 : index
    %c0_39 = arith.constant 0 : index
    %c0_40 = arith.constant 0 : index
    %70 = vector.load %arg17[%c0_38, %c0_39, %c0_40] : memref<4x4x512xf32, #tpu.memory_space<vmem>>, vector<4x4x512xf32>
    tpu.vector_store %arg17[%c0_38, %c0_39, %c0_40], %69 {strides = array<i32>} : memref<4x4x512xf32, #tpu.memory_space<vmem>>, vector<4x4x512xf32>,
    %c0_41 = arith.constant 0 : index
    %c0_42 = arith.constant 0 : index
    %71 = vector.load %arg6[%c0_41, %c0_42] : memref<1x32xf32, #tpu.memory_space<vmem>>, vector<1x32xf32>
    %72 = vector.shape_cast %71 : vector<1x32xf32> to vector<1x32xf32>
    %73 = vector.broadcast %72 : vector<1x32xf32> to vector<4x32xf32>
    %c0_43 = arith.constant 0 : index
    %c0_44 = arith.constant 0 : index
    %74 = vector.load %arg7[%c0_43, %c0_44] : memref<32x32xf32, #tpu.memory_space<vmem>>, vector<32x32xf32>
    %cst_45 = arith.constant dense<0.000000e+00> : vector<4x32xf32>
    %75 = tpu.matmul %73, %74, %cst_45 {dimension_numbers = #tpu.dot_dimension_numbers<[1], [0], [0], [1], [0, 0, 1, 1], [], []>} : vector<4x32xf32>, vector<32x32xf32>, vector<4x32xf32> -> vector<4x32xf32>
    %c0_46 = arith.constant 0 : index
    %c0_47 = arith.constant 0 : index
    %76 = vector.load %arg8[%c0_46, %c0_47] : memref<1x32xf32, #tpu.memory_space<vmem>>, vector<1x32xf32>
    %77 = vector.broadcast %76 : vector<1x32xf32> to vector<4x32xf32>
    %78 = arith.addf %75, %77 : vector<4x32xf32>
    %79 = arith.mulf %78, %78 : vector<4x32xf32>
    %80 = arith.mulf %78, %79 : vector<4x32xf32>
    %cst_48 = arith.constant 4.471500e-02 : f32
    %81 = vector.broadcast %cst_48 : f32 to vector<4x32xf32>
    %82 = arith.mulf %81, %80 : vector<4x32xf32>
    %83 = arith.addf %78, %82 : vector<4x32xf32>
    %cst_49 = arith.constant 0.797884583 : f32
    %84 = vector.broadcast %cst_49 : f32 to vector<4x32xf32>
    %85 = arith.mulf %84, %83 : vector<4x32xf32>
    %86 = math.tanh %85 : vector<4x32xf32>
    %cst_50 = arith.constant 1.000000e+00 : f32
    %87 = vector.broadcast %cst_50 : f32 to vector<4x32xf32>
    %88 = arith.addf %87, %86 : vector<4x32xf32>
    %cst_51 = arith.constant 5.000000e-01 : f32
    %89 = vector.broadcast %cst_51 : f32 to vector<4x32xf32>
    %90 = arith.mulf %89, %88 : vector<4x32xf32>
    %91 = arith.mulf %78, %90 : vector<4x32xf32>
    %cst_52 = arith.constant dense<0.000000e+00> : vector<4xf32>
    %92 = vector.multi_reduction <add>, %91, %cst_52 [1] : vector<4x32xf32> to vector<4xf32>
    %93 = vector.shape_cast %92 : vector<4xf32> to vector<4x1xf32>
    %cst_53 = arith.constant 3.200000e+01 : f32
    %94 = vector.broadcast %cst_53 : f32 to vector<4x1xf32>
    %95 = arith.divf %93, %94 : vector<4x1xf32>
    %96 = vector.broadcast %95 : vector<4x1xf32> to vector<4x32xf32>
    %97 = arith.subf %91, %96 : vector<4x32xf32>
    %98 = arith.mulf %97, %97 : vector<4x32xf32>
    %cst_54 = arith.constant dense<0.000000e+00> : vector<4xf32>
    %99 = vector.multi_reduction <add>, %98, %cst_54 [1] : vector<4x32xf32> to vector<4xf32>
    %100 = vector.shape_cast %99 : vector<4xf32> to vector<4x1xf32>
    %cst_55 = arith.constant 3.200000e+01 : f32
    %101 = vector.broadcast %cst_55 : f32 to vector<4x1xf32>
    %102 = arith.divf %100, %101 : vector<4x1xf32>
    %103 = vector.broadcast %95 : vector<4x1xf32> to vector<4x32xf32>
    %104 = arith.subf %91, %103 : vector<4x32xf32>
    %cst_56 = arith.constant 9.99999974E-6 : f32
    %105 = vector.broadcast %cst_56 : f32 to vector<4x1xf32>
    %106 = arith.addf %102, %105 : vector<4x1xf32>
    %107 = math.rsqrt %106 : vector<4x1xf32>
    %108 = vector.broadcast %107 : vector<4x1xf32> to vector<4x32xf32>
    %109 = arith.mulf %104, %108 : vector<4x32xf32>
    %c0_57 = arith.constant 0 : index
    %c0_58 = arith.constant 0 : index
    %110 = vector.load %arg9[%c0_57, %c0_58] : memref<1x32xf32, #tpu.memory_space<vmem>>, vector<1x32xf32>
    %111 = vector.broadcast %110 : vector<1x32xf32> to vector<4x32xf32>
    %112 = arith.mulf %109, %111 : vector<4x32xf32>
    %c0_59 = arith.constant 0 : index
    %c0_60 = arith.constant 0 : index
    %113 = vector.load %arg10[%c0_59, %c0_60] : memref<1x32xf32, #tpu.memory_space<vmem>>, vector<1x32xf32>
    %114 = vector.broadcast %113 : vector<1x32xf32> to vector<4x32xf32>
    %115 = arith.addf %112, %114 : vector<4x32xf32>
    %c0_61 = arith.constant 0 : index
    %c0_62 = arith.constant 0 : index
    %116 = vector.load %arg11[%c0_61, %c0_62] : memref<32x128xf32, #tpu.memory_space<vmem>>, vector<32x128xf32>
    %cst_63 = arith.constant dense<0.000000e+00> : vector<4x128xf32>
    %117 = tpu.matmul %115, %116, %cst_63 {dimension_numbers = #tpu.dot_dimension_numbers<[1], [0], [0], [1], [0, 0, 1, 1], [], []>} : vector<4x32xf32>, vector<32x128xf32>, vector<4x128xf32> -> vector<4x128xf32>
    %c0_64 = arith.constant 0 : index
    %c0_65 = arith.constant 0 : index
    %118 = vector.load %arg12[%c0_64, %c0_65] : memref<1x128xf32, #tpu.memory_space<vmem>>, vector<1x128xf32>
    %119 = vector.broadcast %118 : vector<1x128xf32> to vector<4x128xf32>
    %120 = arith.addf %117, %119 : vector<4x128xf32>
    %121 = vector.shape_cast %120 : vector<4x128xf32> to vector<4x1x128xf32>
    %c0_66 = arith.constant 0 : index
    %c0_67 = arith.constant 0 : index
    %c0_68 = arith.constant 0 : index
    %122 = vector.load %arg15[%c0_66, %c0_67, %c0_68] : memref<4x1x128xf32, #tpu.memory_space<vmem>>, vector<4x1x128xf32>
    tpu.vector_store %arg15[%c0_66, %c0_67, %c0_68], %121 {strides = array<i32>} : memref<4x1x128xf32, #tpu.memory_space<vmem>>, vector<4x1x128xf32>,
    return
  }
  func.func @transform_0(%arg0: i32) -> (i32, i32, i32) {
    %c0_i32 = arith.constant 0 : i32
    %c0_i32_0 = arith.constant 0 : i32
    %c0_i32_1 = arith.constant 0 : i32
    return %arg0, %c0_i32, %c0_i32_0 : i32, i32, i32
  }
  func.func @transform_1(%arg0: i32) -> (i32, i32, i32) {
    %c0_i32 = arith.constant 0 : i32
    %c0_i32_0 = arith.constant 0 : i32
    %c0_i32_1 = arith.constant 0 : i32
    return %arg0, %c0_i32, %c0_i32_0 : i32, i32, i32
  }
  func.func @transform_2(%arg0: i32) -> (i32, i32) {
    %c0_i32 = arith.constant 0 : i32
    %c0_i32_0 = arith.constant 0 : i32
    %c0_i32_1 = arith.constant 0 : i32
    return %c0_i32, %c0_i32_0 : i32, i32
  }
  func.func @transform_3(%arg0: i32) -> (i32, i32) {
    %c0_i32 = arith.constant 0 : i32
    %c0_i32_0 = arith.constant 0 : i32
    %c0_i32_1 = arith.constant 0 : i32
    return %c0_i32, %c0_i32_0 : i32, i32
  }
  func.func @transform_4(%arg0: i32) -> (i32, i32) {
    %c0_i32 = arith.constant 0 : i32
    %c0_i32_0 = arith.constant 0 : i32
    %c0_i32_1 = arith.constant 0 : i32
    return %c0_i32, %c0_i32_0 : i32, i32
  }
  func.func @transform_5(%arg0: i32) -> (i32, i32) {
    %c0_i32 = arith.constant 0 : i32
    %c0_i32_0 = arith.constant 0 : i32
    %c0_i32_1 = arith.constant 0 : i32
    return %c0_i32, %c0_i32_0 : i32, i32
  }
  func.func @transform_6(%arg0: i32) -> (i32, i32) {
    %c0_i32 = arith.constant 0 : i32
    %c0_i32_0 = arith.constant 0 : i32
    %c0_i32_1 = arith.constant 0 : i32
    return %c0_i32, %c0_i32_0 : i32, i32
  }
  func.func @transform_7(%arg0: i32) -> (i32, i32) {
    %c0_i32 = arith.constant 0 : i32
    %c0_i32_0 = arith.constant 0 : i32
    %c0_i32_1 = arith.constant 0 : i32
    return %c0_i32, %c0_i32_0 : i32, i32
  }
  func.func @transform_8(%arg0: i32) -> (i32, i32) {
    %c0_i32 = arith.constant 0 : i32
    %c0_i32_0 = arith.constant 0 : i32
    %c0_i32_1 = arith.constant 0 : i32
    return %c0_i32, %c0_i32_0 : i32, i32
  }
  func.func @transform_9(%arg0: i32) -> (i32, i32) {
    %c0_i32 = arith.constant 0 : i32
    %c0_i32_0 = arith.constant 0 : i32
    %c0_i32_1 = arith.constant 0 : i32
    return %c0_i32, %c0_i32_0 : i32, i32
  }
  func.func @transform_10(%arg0: i32) -> (i32, i32) {
    %c0_i32 = arith.constant 0 : i32
    %c0_i32_0 = arith.constant 0 : i32
    %c0_i32_1 = arith.constant 0 : i32
    return %c0_i32, %c0_i32_0 : i32, i32
  }
  func.func @transform_11(%arg0: i32) -> (i32, i32) {
    %c0_i32 = arith.constant 0 : i32
    %c0_i32_0 = arith.constant 0 : i32
    %c0_i32_1 = arith.constant 0 : i32
    return %c0_i32, %c0_i32_0 : i32, i32
  }
  func.func @transform_12(%arg0: i32) -> (i32, i32) {
    %c0_i32 = arith.constant 0 : i32
    %c0_i32_0 = arith.constant 0 : i32
    %c0_i32_1 = arith.constant 0 : i32
    return %c0_i32, %c0_i32_0 : i32, i32
  }
  func.func @transform_13(%arg0: i32) -> (i32, i32) {
    %c0_i32 = arith.constant 0 : i32
    %c0_i32_0 = arith.constant 0 : i32
    %c0_i32_1 = arith.constant 0 : i32
    return %c0_i32, %c0_i32_0 : i32, i32
  }
  func.func @transform_14(%arg0: i32) -> (i32, i32, i32) {
    %c0_i32 = arith.constant 0 : i32
    %c0_i32_0 = arith.constant 0 : i32
    %c0_i32_1 = arith.constant 0 : i32
    return %arg0, %c0_i32, %c0_i32_0 : i32, i32, i32
  }
  func.func @transform_15(%arg0: i32) -> (i32, i32, i32) {
    %c0_i32 = arith.constant 0 : i32
    %c0_i32_0 = arith.constant 0 : i32
    %c0_i32_1 = arith.constant 0 : i32
    return %arg0, %c0_i32, %c0_i32_0 : i32, i32, i32
  }
  func.func @transform_16(%arg0: i32) -> (i32, i32, i32) {
    %c0_i32 = arith.constant 0 : i32
    %c0_i32_0 = arith.constant 0 : i32
    %c0_i32_1 = arith.constant 0 : i32
    return %arg0, %c0_i32, %c0_i32_0 : i32, i32, i32
  }
}

module attributes {stable_mosaic.version = 11 : i64} {
  func.func @_fused_vit_kernel(%arg0: i32, %arg1: memref<4x4x768xf32, #tpu.memory_space<vmem>>, %arg2: memref<4x4x1xf32, #tpu.memory_space<vmem>>, %arg3: memref<768x32xf32, #tpu.memory_space<vmem>>, %arg4: memref<1x32xf32, #tpu.memory_space<vmem>>, %arg5: memref<1x32xf32, #tpu.memory_space<vmem>>, %arg6: memref<1x32xf32, #tpu.memory_space<vmem>>, %arg7: memref<32x32xf32, #tpu.memory_space<vmem>>, %arg8: memref<1x32xf32, #tpu.memory_space<vmem>>, %arg9: memref<1x32xf32, #tpu.memory_space<vmem>>, %arg10: memref<1x32xf32, #tpu.memory_space<vmem>>, %arg11: memref<32x128xf32, #tpu.memory_space<vmem>>, %arg12: memref<1x128xf32, #tpu.memory_space<vmem>>, %arg13: memref<32x512xf32, #tpu.memory_space<vmem>>, %arg14: memref<1x512xf32, #tpu.memory_space<vmem>>, %arg15: memref<4x1x128xf32, #tpu.memory_space<vmem>>, %arg16: memref<4x4x32xf32, #tpu.memory_space<vmem>>, %arg17: memref<4x4x512xf32, #tpu.memory_space<vmem>>) attributes {dimension_semantics = [#tpu.dimension_semantics<parallel>], iteration_bounds = array<i64: 1>, scalar_prefetch = 0 : i64, scratch_operands = 0 : i64, tpu.core_type = #tpu.core_type<tc>, window_params = [{transform_indices = @transform_0, window_bounds = array<i64: 4, 4, 768>}, {transform_indices = @transform_1, window_bounds = array<i64: 4, 4, 1>}, {pipeline_mode = #tpu.pipeline_mode<synchronous>, transform_indices = @transform_2, window_bounds = array<i64: 768, 32>}, {pipeline_mode = #tpu.pipeline_mode<synchronous>, transform_indices = @transform_3, window_bounds = array<i64: 1, 32>}, {pipeline_mode = #tpu.pipeline_mode<synchronous>, transform_indices = @transform_4, window_bounds = array<i64: 1, 32>}, {pipeline_mode = #tpu.pipeline_mode<synchronous>, transform_indices = @transform_5, window_bounds = array<i64: 1, 32>}, {pipeline_mode = #tpu.pipeline_mode<synchronous>, transform_indices = @transform_6, window_bounds = array<i64: 32, 32>}, {pipeline_mode = #tpu.pipeline_mode<synchronous>, transform_indices = @transform_7, window_bounds = array<i64: 1, 32>}, {pipeline_mode = #tpu.pipeline_mode<synchronous>, transform_indices = @transform_8, window_bounds = array<i64: 1, 32>}, {pipeline_mode = #tpu.pipeline_mode<synchronous>, transform_indices = @transform_9, window_bounds = array<i64: 1, 32>}, {pipeline_mode = #tpu.pipeline_mode<synchronous>, transform_indices = @transform_10, window_bounds = array<i64: 32, 128>}, {pipeline_mode = #tpu.pipeline_mode<synchronous>, transform_indices = @transform_11, window_bounds = array<i64: 1, 128>}, {pipeline_mode = #tpu.pipeline_mode<synchronous>, transform_indices = @transform_12, window_bounds = array<i64: 32, 512>}, {pipeline_mode = #tpu.pipeline_mode<synchronous>, transform_indices = @transform_13, window_bounds = array<i64: 1, 512>}, {transform_indices = @transform_14, window_bounds = array<i64: 4, 1, 128>}, {transform_indices = @transform_15, window_bounds = array<i64: 4, 4, 32>}, {transform_indices = @transform_16, window_bounds = array<i64: 4, 4, 512>}]} {
    %c0 = arith.constant 0 : index
    %c0_0 = arith.constant 0 : index
    %c0_1 = arith.constant 0 : index
    %0 = vector.load %arg1[%c0, %c0_0, %c0_1] : memref<4x4x768xf32, #tpu.memory_space<vmem>>, vector<4x4x768xf32>
    %1 = vector.shape_cast %0 : vector<4x4x768xf32> to vector<16x768xf32>
    %c0_2 = arith.constant 0 : index
    %c0_3 = arith.constant 0 : index
    %2 = vector.load %arg3[%c0_2, %c0_3] : memref<768x32xf32, #tpu.memory_space<vmem>>, vector<768x32xf32>
    %cst = arith.constant dense<0.000000e+00> : vector<16x32xf32>
    %3 = tpu.matmul %1, %2, %cst {dimension_numbers = #tpu.dot_dimension_numbers<[1], [0], [0], [1], [0, 0, 1, 1], [], []>} : vector<16x768xf32>, vector<768x32xf32>, vector<16x32xf32> -> vector<16x32xf32>
    %c0_4 = arith.constant 0 : index
    %c0_5 = arith.constant 0 : index
    %4 = vector.load %arg4[%c0_4, %c0_5] : memref<1x32xf32, #tpu.memory_space<vmem>>, vector<1x32xf32>
    %5 = vector.broadcast %4 : vector<1x32xf32> to vector<16x32xf32>
    %6 = arith.addf %3, %5 : vector<16x32xf32>
    %7 = vector.shape_cast %6 : vector<16x32xf32> to vector<4x4x32xf32>
    %c0_6 = arith.constant 0 : index
    %c0_7 = arith.constant 0 : index
    %c0_8 = arith.constant 0 : index
    %8 = vector.load %arg2[%c0_6, %c0_7, %c0_8] : memref<4x4x1xf32, #tpu.memory_space<vmem>>, vector<4x4x1xf32>
    %c0_9 = arith.constant 0 : index
    %c0_10 = arith.constant 0 : index
    %9 = vector.load %arg5[%c0_9, %c0_10] : memref<1x32xf32, #tpu.memory_space<vmem>>, vector<1x32xf32>
    %10 = vector.shape_cast %9 : vector<1x32xf32> to vector<1x1x32xf32>
    %11 = vector.broadcast %8 : vector<4x4x1xf32> to vector<4x4x32xf32>
    %12 = vector.broadcast %10 : vector<1x1x32xf32> to vector<4x4x32xf32>
    %13 = arith.mulf %11, %12 : vector<4x4x32xf32>
    %cst_11 = arith.constant 1.000000e+00 : f32
    %14 = vector.broadcast %cst_11 : f32 to vector<4x4x1xf32>
    %15 = arith.subf %14, %8 : vector<4x4x1xf32>
    %16 = vector.broadcast %15 : vector<4x4x1xf32> to vector<4x4x32xf32>
    %17 = arith.mulf %16, %7 : vector<4x4x32xf32>
    %18 = arith.addf %13, %17 : vector<4x4x32xf32>
    %19 = vector.shape_cast %18 : vector<4x4x32xf32> to vector<16x32xf32>
    %c0_12 = arith.constant 0 : index
    %c0_13 = arith.constant 0 : index
    %20 = vector.load %arg7[%c0_12, %c0_13] : memref<32x32xf32, #tpu.memory_space<vmem>>, vector<32x32xf32>
    %cst_14 = arith.constant dense<0.000000e+00> : vector<16x32xf32>
    %21 = tpu.matmul %19, %20, %cst_14 {dimension_numbers = #tpu.dot_dimension_numbers<[1], [0], [0], [1], [0, 0, 1, 1], [], []>} : vector<16x32xf32>, vector<32x32xf32>, vector<16x32xf32> -> vector<16x32xf32>
    %c0_15 = arith.constant 0 : index
    %c0_16 = arith.constant 0 : index
    %22 = vector.load %arg8[%c0_15, %c0_16] : memref<1x32xf32, #tpu.memory_space<vmem>>, vector<1x32xf32>
    %23 = vector.broadcast %22 : vector<1x32xf32> to vector<16x32xf32>
    %24 = arith.addf %21, %23 : vector<16x32xf32>
    %25 = arith.mulf %24, %24 : vector<16x32xf32>
    %26 = arith.mulf %24, %25 : vector<16x32xf32>
    %cst_17 = arith.constant 4.471500e-02 : f32
    %27 = vector.broadcast %cst_17 : f32 to vector<16x32xf32>
    %28 = arith.mulf %27, %26 : vector<16x32xf32>
    %29 = arith.addf %24, %28 : vector<16x32xf32>
    %cst_18 = arith.constant 0.797884583 : f32
    %30 = vector.broadcast %cst_18 : f32 to vector<16x32xf32>
    %31 = arith.mulf %30, %29 : vector<16x32xf32>
    %32 = math.tanh %31 : vector<16x32xf32>
    %cst_19 = arith.constant 1.000000e+00 : f32
    %33 = vector.broadcast %cst_19 : f32 to vector<16x32xf32>
    %34 = arith.addf %33, %32 : vector<16x32xf32>
    %cst_20 = arith.constant 5.000000e-01 : f32
    %35 = vector.broadcast %cst_20 : f32 to vector<16x32xf32>
    %36 = arith.mulf %35, %34 : vector<16x32xf32>
    %37 = arith.mulf %24, %36 : vector<16x32xf32>
    %cst_21 = arith.constant dense<0.000000e+00> : vector<16xf32>
    %38 = vector.multi_reduction <add>, %37, %cst_21 [1] : vector<16x32xf32> to vector<16xf32>
    %39 = vector.shape_cast %38 : vector<16xf32> to vector<16x1xf32>
    %cst_22 = arith.constant 3.200000e+01 : f32
    %40 = vector.broadcast %cst_22 : f32 to vector<16x1xf32>
    %41 = arith.divf %39, %40 : vector<16x1xf32>
    %42 = vector.broadcast %41 : vector<16x1xf32> to vector<16x32xf32>
    %43 = arith.subf %37, %42 : vector<16x32xf32>
    %44 = arith.mulf %43, %43 : vector<16x32xf32>
    %cst_23 = arith.constant dense<0.000000e+00> : vector<16xf32>
    %45 = vector.multi_reduction <add>, %44, %cst_23 [1] : vector<16x32xf32> to vector<16xf32>
    %46 = vector.shape_cast %45 : vector<16xf32> to vector<16x1xf32>
    %cst_24 = arith.constant 3.200000e+01 : f32
    %47 = vector.broadcast %cst_24 : f32 to vector<16x1xf32>
    %48 = arith.divf %46, %47 : vector<16x1xf32>
    %49 = vector.broadcast %41 : vector<16x1xf32> to vector<16x32xf32>
    %50 = arith.subf %37, %49 : vector<16x32xf32>
    %cst_25 = arith.constant 9.99999974E-6 : f32
    %51 = vector.broadcast %cst_25 : f32 to vector<16x1xf32>
    %52 = arith.addf %48, %51 : vector<16x1xf32>
    %53 = math.rsqrt %52 : vector<16x1xf32>
    %54 = vector.broadcast %53 : vector<16x1xf32> to vector<16x32xf32>
    %55 = arith.mulf %50, %54 : vector<16x32xf32>
    %c0_26 = arith.constant 0 : index
    %c0_27 = arith.constant 0 : index
    %56 = vector.load %arg9[%c0_26, %c0_27] : memref<1x32xf32, #tpu.memory_space<vmem>>, vector<1x32xf32>
    %57 = vector.broadcast %56 : vector<1x32xf32> to vector<16x32xf32>
    %58 = arith.mulf %55, %57 : vector<16x32xf32>
    %c0_28 = arith.constant 0 : index
    %c0_29 = arith.constant 0 : index
    %59 = vector.load %arg10[%c0_28, %c0_29] : memref<1x32xf32, #tpu.memory_space<vmem>>, vector<1x32xf32>
    %60 = vector.broadcast %59 : vector<1x32xf32> to vector<16x32xf32>
    %61 = arith.addf %58, %60 : vector<16x32xf32>
    %62 = vector.shape_cast %61 : vector<16x32xf32> to vector<4x4x32xf32>
    %c0_30 = arith.constant 0 : index
    %c0_31 = arith.constant 0 : index
    %c0_32 = arith.constant 0 : index
    %63 = vector.load %arg16[%c0_30, %c0_31, %c0_32] : memref<4x4x32xf32, #tpu.memory_space<vmem>>, vector<4x4x32xf32>
    tpu.vector_store %arg16[%c0_30, %c0_31, %c0_32], %62 {strides = array<i32>} : memref<4x4x32xf32, #tpu.memory_space<vmem>>, vector<4x4x32xf32>,
    %c0_33 = arith.constant 0 : index
    %c0_34 = arith.constant 0 : index
    %64 = vector.load %arg13[%c0_33, %c0_34] : memref<32x512xf32, #tpu.memory_space<vmem>>, vector<32x512xf32>
    %cst_35 = arith.constant dense<0.000000e+00> : vector<16x512xf32>
    %65 = tpu.matmul %61, %64, %cst_35 {dimension_numbers = #tpu.dot_dimension_numbers<[1], [0], [0], [1], [0, 0, 1, 1], [], []>} : vector<16x32xf32>, vector<32x512xf32>, vector<16x512xf32> -> vector<16x512xf32>
    %c0_36 = arith.constant 0 : index
    %c0_37 = arith.constant 0 : index
    %66 = vector.load %arg14[%c0_36, %c0_37] : memref<1x512xf32, #tpu.memory_space<vmem>>, vector<1x512xf32>
    %67 = vector.broadcast %66 : vector<1x512xf32> to vector<16x512xf32>
    %68 = arith.addf %65, %67 : vector<16x512xf32>
    %69 = vector.shape_cast %68 : vector<16x512xf32> to vector<4x4x512xf32>
    %c0_38 = arith.constant 0 : index
    %c0_39 = arith.constant 0 : index
    %c0_40 = arith.constant 0 : index
    %70 = vector.load %arg17[%c0_38, %c0_39, %c0_40] : memref<4x4x512xf32, #tpu.memory_space<vmem>>, vector<4x4x512xf32>
    tpu.vector_store %arg17[%c0_38, %c0_39, %c0_40], %69 {strides = array<i32>} : memref<4x4x512xf32, #tpu.memory_space<vmem>>, vector<4x4x512xf32>,
    %c0_41 = arith.constant 0 : index
    %c0_42 = arith.constant 0 : index
    %71 = vector.load %arg6[%c0_41, %c0_42] : memref<1x32xf32, #tpu.memory_space<vmem>>, vector<1x32xf32>
    %72 = vector.shape_cast %71 : vector<1x32xf32> to vector<1x32xf32>
    %73 = vector.broadcast %72 : vector<1x32xf32> to vector<4x32xf32>
    %c0_43 = arith.constant 0 : index
    %c0_44 = arith.constant 0 : index
    %74 = vector.load %arg7[%c0_43, %c0_44] : memref<32x32xf32, #tpu.memory_space<vmem>>, vector<32x32xf32>
    %cst_45 = arith.constant dense<0.000000e+00> : vector<4x32xf32>
    %75 = tpu.matmul %73, %74, %cst_45 {dimension_numbers = #tpu.dot_dimension_numbers<[1], [0], [0], [1], [0, 0, 1, 1], [], []>} : vector<4x32xf32>, vector<32x32xf32>, vector<4x32xf32> -> vector<4x32xf32>
    %c0_46 = arith.constant 0 : index
    %c0_47 = arith.constant 0 : index
    %76 = vector.load %arg8[%c0_46, %c0_47] : memref<1x32xf32, #tpu.memory_space<vmem>>, vector<1x32xf32>
    %77 = vector.broadcast %76 : vector<1x32xf32> to vector<4x32xf32>
    %78 = arith.addf %75, %77 : vector<4x32xf32>
    %79 = arith.mulf %78, %78 : vector<4x32xf32>
    %80 = arith.mulf %78, %79 : vector<4x32xf32>
    %cst_48 = arith.constant 4.471500e-02 : f32
    %81 = vector.broadcast %cst_48 : f32 to vector<4x32xf32>
    %82 = arith.mulf %81, %80 : vector<4x32xf32>
    %83 = arith.addf %78, %82 : vector<4x32xf32>
    %cst_49 = arith.constant 0.797884583 : f32
    %84 = vector.broadcast %cst_49 : f32 to vector<4x32xf32>
    %85 = arith.mulf %84, %83 : vector<4x32xf32>
    %86 = math.tanh %85 : vector<4x32xf32>
    %cst_50 = arith.constant 1.000000e+00 : f32
    %87 = vector.broadcast %cst_50 : f32 to vector<4x32xf32>
    %88 = arith.addf %87, %86 : vector<4x32xf32>
    %cst_51 = arith.constant 5.000000e-01 : f32
    %89 = vector.broadcast %cst_51 : f32 to vector<4x32xf32>
    %90 = arith.mulf %89, %88 : vector<4x32xf32>
    %91 = arith.mulf %78, %90 : vector<4x32xf32>
    %cst_52 = arith.constant dense<0.000000e+00> : vector<4xf32>
    %92 = vector.multi_reduction <add>, %91, %cst_52 [1] : vector<4x32xf32> to vector<4xf32>
    %93 = vector.shape_cast %92 : vector<4xf32> to vector<4x1xf32>
    %cst_53 = arith.constant 3.200000e+01 : f32
    %94 = vector.broadcast %cst_53 : f32 to vector<4x1xf32>
    %95 = arith.divf %93, %94 : vector<4x1xf32>
    %96 = vector.broadcast %95 : vector<4x1xf32> to vector<4x32xf32>
    %97 = arith.subf %91, %96 : vector<4x32xf32>
    %98 = arith.mulf %97, %97 : vector<4x32xf32>
    %cst_54 = arith.constant dense<0.000000e+00> : vector<4xf32>
    %99 = vector.multi_reduction <add>, %98, %cst_54 [1] : vector<4x32xf32> to vector<4xf32>
    %100 = vector.shape_cast %99 : vector<4xf32> to vector<4x1xf32>
    %cst_55 = arith.constant 3.200000e+01 : f32
    %101 = vector.broadcast %cst_55 : f32 to vector<4x1xf32>
    %102 = arith.divf %100, %101 : vector<4x1xf32>
    %103 = vector.broadcast %95 : vector<4x1xf32> to vector<4x32xf32>
    %104 = arith.subf %91, %103 : vector<4x32xf32>
    %cst_56 = arith.constant 9.99999974E-6 : f32
    %105 = vector.broadcast %cst_56 : f32 to vector<4x1xf32>
    %106 = arith.addf %102, %105 : vector<4x1xf32>
    %107 = math.rsqrt %106 : vector<4x1xf32>
    %108 = vector.broadcast %107 : vector<4x1xf32> to vector<4x32xf32>
    %109 = arith.mulf %104, %108 : vector<4x32xf32>
    %c0_57 = arith.constant 0 : index
    %c0_58 = arith.constant 0 : index
    %110 = vector.load %arg9[%c0_57, %c0_58] : memref<1x32xf32, #tpu.memory_space<vmem>>, vector<1x32xf32>
    %111 = vector.broadcast %110 : vector<1x32xf32> to vector<4x32xf32>
    %112 = arith.mulf %109, %111 : vector<4x32xf32>
    %c0_59 = arith.constant 0 : index
    %c0_60 = arith.constant 0 : index
    %113 = vector.load %arg10[%c0_59, %c0_60] : memref<1x32xf32, #tpu.memory_space<vmem>>, vector<1x32xf32>
    %114 = vector.broadcast %113 : vector<1x32xf32> to vector<4x32xf32>
    %115 = arith.addf %112, %114 : vector<4x32xf32>
    %c0_61 = arith.constant 0 : index
    %c0_62 = arith.constant 0 : index
    %116 = vector.load %arg11[%c0_61, %c0_62] : memref<32x128xf32, #tpu.memory_space<vmem>>, vector<32x128xf32>
    %cst_63 = arith.constant dense<0.000000e+00> : vector<4x128xf32>
    %117 = tpu.matmul %115, %116, %cst_63 {dimension_numbers = #tpu.dot_dimension_numbers<[1], [0], [0], [1], [0, 0, 1, 1], [], []>} : vector<4x32xf32>, vector<32x128xf32>, vector<4x128xf32> -> vector<4x128xf32>
    %c0_64 = arith.constant 0 : index
    %c0_65 = arith.constant 0 : index
    %118 = vector.load %arg12[%c0_64, %c0_65] : memref<1x128xf32, #tpu.memory_space<vmem>>, vector<1x128xf32>
    %119 = vector.broadcast %118 : vector<1x128xf32> to vector<4x128xf32>
    %120 = arith.addf %117, %119 : vector<4x128xf32>
    %121 = vector.shape_cast %120 : vector<4x128xf32> to vector<4x1x128xf32>
    %c0_66 = arith.constant 0 : index
    %c0_67 = arith.constant 0 : index
    %c0_68 = arith.constant 0 : index
    %122 = vector.load %arg15[%c0_66, %c0_67, %c0_68] : memref<4x1x128xf32, #tpu.memory_space<vmem>>, vector<4x1x128xf32>
    tpu.vector_store %arg15[%c0_66, %c0_67, %c0_68], %121 {strides = array<i32>} : memref<4x1x128xf32, #tpu.memory_space<vmem>>, vector<4x1x128xf32>,
    return
  }
  func.func @transform_0(%arg0: i32) -> (i32, i32, i32) {
    %c0_i32 = arith.constant 0 : i32
    %c0_i32_0 = arith.constant 0 : i32
    %c0_i32_1 = arith.constant 0 : i32
    return %arg0, %c0_i32, %c0_i32_0 : i32, i32, i32
  }
  func.func @transform_1(%arg0: i32) -> (i32, i32, i32) {
    %c0_i32 = arith.constant 0 : i32
    %c0_i32_0 = arith.constant 0 : i32
    %c0_i32_1 = arith.constant 0 : i32
    return %arg0, %c0_i32, %c0_i32_0 : i32, i32, i32
  }
  func.func @transform_2(%arg0: i32) -> (i32, i32) {
    %c0_i32 = arith.constant 0 : i32
    %c0_i32_0 = arith.constant 0 : i32
    %c0_i32_1 = arith.constant 0 : i32
    return %c0_i32, %c0_i32_0 : i32, i32
  }
  func.func @transform_3(%arg0: i32) -> (i32, i32) {
    %c0_i32 = arith.constant 0 : i32
    %c0_i32_0 = arith.constant 0 : i32
    %c0_i32_1 = arith.constant 0 : i32
    return %c0_i32, %c0_i32_0 : i32, i32
  }
  func.func @transform_4(%arg0: i32) -> (i32, i32) {
    %c0_i32 = arith.constant 0 : i32
    %c0_i32_0 = arith.constant 0 : i32
    %c0_i32_1 = arith.constant 0 : i32
    return %c0_i32, %c0_i32_0 : i32, i32
  }
  func.func @transform_5(%arg0: i32) -> (i32, i32) {
    %c0_i32 = arith.constant 0 : i32
    %c0_i32_0 = arith.constant 0 : i32
    %c0_i32_1 = arith.constant 0 : i32
    return %c0_i32, %c0_i32_0 : i32, i32
  }
  func.func @transform_6(%arg0: i32) -> (i32, i32) {
    %c0_i32 = arith.constant 0 : i32
    %c0_i32_0 = arith.constant 0 : i32
    %c0_i32_1 = arith.constant 0 : i32
    return %c0_i32, %c0_i32_0 : i32, i32
  }
  func.func @transform_7(%arg0: i32) -> (i32, i32) {
    %c0_i32 = arith.constant 0 : i32
    %c0_i32_0 = arith.constant 0 : i32
    %c0_i32_1 = arith.constant 0 : i32
    return %c0_i32, %c0_i32_0 : i32, i32
  }
  func.func @transform_8(%arg0: i32) -> (i32, i32) {
    %c0_i32 = arith.constant 0 : i32
    %c0_i32_0 = arith.constant 0 : i32
    %c0_i32_1 = arith.constant 0 : i32
    return %c0_i32, %c0_i32_0 : i32, i32
  }
  func.func @transform_9(%arg0: i32) -> (i32, i32) {
    %c0_i32 = arith.constant 0 : i32
    %c0_i32_0 = arith.constant 0 : i32
    %c0_i32_1 = arith.constant 0 : i32
    return %c0_i32, %c0_i32_0 : i32, i32
  }
  func.func @transform_10(%arg0: i32) -> (i32, i32) {
    %c0_i32 = arith.constant 0 : i32
    %c0_i32_0 = arith.constant 0 : i32
    %c0_i32_1 = arith.constant 0 : i32
    return %c0_i32, %c0_i32_0 : i32, i32
  }
  func.func @transform_11(%arg0: i32) -> (i32, i32) {
    %c0_i32 = arith.constant 0 : i32
    %c0_i32_0 = arith.constant 0 : i32
    %c0_i32_1 = arith.constant 0 : i32
    return %c0_i32, %c0_i32_0 : i32, i32
  }
  func.func @transform_12(%arg0: i32) -> (i32, i32) {
    %c0_i32 = arith.constant 0 : i32
    %c0_i32_0 = arith.constant 0 : i32
    %c0_i32_1 = arith.constant 0 : i32
    return %c0_i32, %c0_i32_0 : i32, i32
  }
  func.func @transform_13(%arg0: i32) -> (i32, i32) {
    %c0_i32 = arith.constant 0 : i32
    %c0_i32_0 = arith.constant 0 : i32
    %c0_i32_1 = arith.constant 0 : i32
    return %c0_i32, %c0_i32_0 : i32, i32
  }
  func.func @transform_14(%arg0: i32) -> (i32, i32, i32) {
    %c0_i32 = arith.constant 0 : i32
    %c0_i32_0 = arith.constant 0 : i32
    %c0_i32_1 = arith.constant 0 : i32
    return %arg0, %c0_i32, %c0_i32_0 : i32, i32, i32
  }
  func.func @transform_15(%arg0: i32) -> (i32, i32, i32) {
    %c0_i32 = arith.constant 0 : i32
    %c0_i32_0 = arith.constant 0 : i32
    %c0_i32_1 = arith.constant 0 : i32
    return %arg0, %c0_i32, %c0_i32_0 : i32, i32, i32
  }
  func.func @transform_16(%arg0: i32) -> (i32, i32, i32) {
    %c0_i32 = arith.constant 0 : i32
    %c0_i32_0 = arith.constant 0 : i32
    %c0_i32_1 = arith.constant 0 : i32
    return %arg0, %c0_i32, %c0_i32_0 : i32, i32, i32
  }
}

</mosaic_0001>

<bundles_post_ra>
// kernel: continual_mae_forward.4
= control target key start
LH: loop header
LB: loop body
LE: loop exit
PB: predicated region body
PF: predicated region fallthrough
CT: control target
= control target key end

     0   :  { %s2974_s0 = inlined_call_operand.vmem [shape: f32[20,4,768], index: 0, kind: input, shape index: {}]   ;;  %s2975_s1 = inlined_call_operand.vmem [shape: f32[20,4,1], index: 1, kind: input, shape index: {}]   ;;  %s2976_s2 = inlined_call_operand.vmem [shape: f32[768,32], index: 2, kind: input, shape index: {}]   ;;  %s2977_s3 = inlined_call_operand.vmem [shape: f32[1,32], index: 3, kind: input, shape index: {}]   ;;  %s2978_s4 = inlined_call_operand.vmem [shape: f32[1,32], index: 4, kind: input, shape index: {}]   ;;  %s2979_s5 = inlined_call_operand.vmem [shape: f32[1,32], index: 5, kind: input, shape index: {}]   ;;  %s2980_s6 = inlined_call_operand.vmem [shape: f32[32,32], index: 6, kind: input, shape index: {}]   ;;  %s2981_s7 = inlined_call_operand.vmem [shape: f32[1,32], index: 7, kind: input, shape index: {}]   ;;  %s2982_s8 = inlined_call_operand.vmem [shape: f32[1,32], index: 8, kind: input, shape index: {}]   ;;  %s2983_s9 = inlined_call_operand.vmem [shape: f32[1,32], index: 9, kind: input, shape index: {}]   ;;  %s2984_s10 = inlined_call_operand.vmem [shape: f32[32,128], index: 10, kind: input, shape index: {}]   ;;  %s2985_s11 = inlined_call_operand.vmem [shape: f32[1,128], index: 11, kind: input, shape index: {}]   ;;  %s2986_s12 = inlined_call_operand.vmem [shape: f32[32,512], index: 12, kind: input, shape index: {}]   ;;  %s2987_s13 = inlined_call_operand.vmem [shape: f32[1,512], index: 13, kind: input, shape index: {}]   ;;  %s2988_s14 = inlined_call_operand.hbm [shape: f32[20,1,128], index: 14, kind: output, shape index: {0}]   ;;  %s2989_s15 = inlined_call_operand.vmem [shape: f32[20,4,32], index: 15, kind: output, shape index: {1}]   ;;  %s2990_s16 = inlined_call_operand.hbm [shape: f32[20,4,512], index: 16, kind: output, shape index: {2}]  }
   0x1   :  { %2999 = sst [smem:[#allocation14_spill]] %s2974_s0 }
   0x2   :  { %3000 = sst [smem:[#allocation15_spill]] %s2985_s11 }
   0x3   :  { %3001 = sst [smem:[#allocation16_spill]] %s2988_s14 }
   0x4   :  { %22 = vsyncpa [#allocation3], 0 }
   0x5   :  { %24 = vsyncpa [#allocation3 + $0x1], 0 }
   0x6   :  { %25 = vsyncpa [#allocation5], 0 }
   0x7   :  { %27 = vsyncpa [#allocation5 + $0x1], 0  ;;  %s2318_s21 = smov 0   ;;  %s2320_s22 = smov 0  }
   0x8   :  { %s2322_s23 = smov 0   ;;  %s2324_s24 = smov 0  }
   0x9 LB: > { %3002 = sst [smem:[#allocation8_spill]] %s2210_s21  ;;  %s2339_s25 = sadd.s32 4294967295, %s2222_s24   ;;  %s2222_s24 = sphi %s2324_s24, %s3018_s24   ;;  %s2218_s23 = sphi %s2322_s23, %s3023_s23   ;;  %s2214_s22 = sphi %s2320_s22, %s3022_s22   ;;  %s2210_s21 = sphi %s2318_s21, %s3021_s21  }
   0xa   : > { %3003 = sst [smem:[#allocation9_spill]] %s2218_s23  ;;  %s1841_s26 = sadd.s32 4294967294, %s2222_s24  }
   0xb   : > { %3004 = sst [smem:[#allocation10_spill]] %s2222_s24  ;;  %s2343_s27 = sadd.s32 1, %s2222_s24  }
   0xc   : > { %3005 = sst [smem:[#allocation11_spill]] %s2343_s27  ;;  %s344_s28 = sadd.s32 1, %s2218_s23 }
   0xd   : > { %s341_s29 = ssub.s32 %s2222_s24, %s2343_s27  ;;  %p354_p0 = scmp.ne.s32.totalorder %s2218_s23, %s2214_s22 }
   0xe   : > { %p342_p1 = scmp.eq.s32.totalorder %s341_s29, 0  ;;  %p355_p2 = scmp.eq.s32.totalorder %s2339_s25, 4 }
   0xf   : > { %p360_p3 = scmp.ne.s32.totalorder %s2214_s22, %s2210_s21  ;;  %p361_p4 = scmp.eq.s32.totalorder %s1841_s26, 4 }
  0x10   : > { %s2354_s30 = scalar_select %p342_p1, %s2218_s23, %s344_s28  }
  0x11   : > { %p2356_p5 = por %p355_p2, %p354_p0  ;;  %p2360_p6 = por %p361_p4, %p360_p3 }
  0x12   : > { %3006 = sst [smem:[#allocation12_spill]] %s2354_s30  ;;  %p1844_p7 = scmp.ge.s32.totalorder %s2222_s24, 1 }
  0x13   : > { %s3008_s17 = scalar_select %p2360_p6, 1, 0 }
  0x14   : > { %p486_p8 = scmp.lt.s32.totalorder %s2222_s24, 6 }
  0x15   : > { %3009 = sst [smem:[#allocation13_spill]] %s3008_s17 }
  0x16   : > { %p487_p9 = pnand %p1844_p7, %p486_p8 }
  0x17   : > { %s2996_s30 = sshll.u32 (!%p487_p9), %s2339_s25, 2  ;;  %s3011_s23 = sshll.u32 (!%p487_p9), %s2339_s25, 2 }
  0x18   : > { %490 = sbr.rel (%p487_p9) target bundleno = 1608 (0x648), region = 76  ;;  %p2427_p10 = scmp.lt.s32.totalorder (!%p487_p9), %s2996_s30, 19 }
  0x19   : > { %s3012_s14 = sld [smem:[#allocation14_spill]] (!%p487_p9) }
  0x1d   : > { %v616_v0 = vld [vmem:[%s2976_s2 + $0xf8] sm:$0xff]  ;;  %v615_v2 = vld [vmem:[%s2976_s2 + $0xf0] sm:$0xff]  ;;  %v2224_v6 = vmov 0   ;;  %v614_v7 = vld [vmem:[%s2976_s2 + $0xe8] sm:$0xff]  ;;  %s3025_s23 = smov (!%p2427_p10, %s3011_s23), 19  ;;  %vm1039_vm0 = vcmask 261120  }
  0x1e   : > { %v600_v1 = vld [vmem:[%s2976_s2 + $0x78] sm:$0xff]  ;;  %1885 = vmatprep.subr.mxu0 %v616_v0  ;;  %v599_v4 = vld [vmem:[%s2976_s2 + $0x70] sm:$0xff]  ;;  %2101 = vset.pattern.permute.xlu1 %v2224_v6  ;;  %v598_v9 = vld [vmem:[%s2976_s2 + $0x68] sm:$0xff]  ;;  %s2048_s21 = smul.u32 24, %s3025_s23  ;;  %s1850_s18 = sshll.u32 %s3025_s23, 2  ;;  %vm2226_vm1 = vmmov 0  }
  0x1f   : > { %v648_v3 = vld [vmem:[%s2976_s2 + $0x1f8] sm:$0xff]  ;;  %1886 = vmatpush3.msra.mxu0 %v600_v1  ;;  %v647_v8 = vld [vmem:[%s2976_s2 + $0x1f0] sm:$0xff]  ;;  %v646_v11 = vld [vmem:[%s2976_s2 + $0x1e8] sm:$0xff]  ;;  %s2613_s28 = scalar_lea.vmem %s2975_s1, %s1850_s18  ;;  %2100 = vset.pattern.permute.xlu0 %v2224_v6  ;;  %vm1188_vm2 = vcmask 257024   ;;  %s2850_s23 = sand.u32 1, %s2214_s22  }
  0x20   : > { %v632_v5 = vld [vmem:[%s2976_s2 + $0x178] sm:$0xff]  ;;  %1923 = vmatprep.subr.mxu1 %v648_v3  ;;  %1887 = vmatprep.subr.mxu0 %v615_v2  ;;  %v631_v10 = vld [vmem:[%s2976_s2 + $0x170] sm:$0xff]  ;;  %v613_v12 = vld [vmem:[%s2976_s2 + $0xe0] sm:$0xff]  ;;  %s2516_s11 = scalar_lea.vmem %s3012_s14, %s2048_s21  ;;  %s1846_s20 = sshll.u32 %s2850_s23, 6 }
  0x21   : > { %1924 = vmatpush3.msra.mxu1 %v632_v5  ;;  %1888 = vmatpush3.msra.mxu0 %v599_v4  ;;  %v630_v13 = vld [vmem:[%s2976_s2 + $0x168] sm:$0xff]  ;;  %v597_v14 = vld [vmem:[%s2976_s2 + $0x60] sm:$0xff]  ;;  %v612_v16 = vld [vmem:[%s2976_s2 + $0xd8] sm:$0xff]  ;;  %s1676_s27 = scalar_lea.sflag [#allocation5], %s2850_s23  ;;  %s2227_s14 = smov [#allocation4]  }
  0x22   : > { %1925 = vmatprep.subr.mxu1 %v647_v8  ;;  %1889 = vmatprep.subr.mxu0 %v614_v7  ;;  %v645_v15 = vld [vmem:[%s2976_s2 + $0x1e0] sm:$0xff]  ;;  %v596_v18 = vld [vmem:[%s2976_s2 + $0x58] sm:$0xff]  ;;  %v611_v20 = vld [vmem:[%s2976_s2 + $0xd0] sm:$0xff]  ;;  %s2136_s21 = sshll.u32 %s2227_s14, 4  ;;  %s2137_s21 = int_to_ptr.vmem [resolvable:$false] %s2136_s21 }
  0x23   : > { %1926 = vmatpush3.msra.mxu1 %v631_v10  ;;  %1890 = vmatpush3.msra.mxu0 %v598_v9  ;;  %v629_v17 = vld [vmem:[%s2976_s2 + $0x160] sm:$0xff]  ;;  %v644_v19 = vld [vmem:[%s2976_s2 + $0x1d8] sm:$0xff]  ;;  %v595_v22 = vld [vmem:[%s2976_s2 + $0x50] sm:$0xff]  ;;  %s2138_s26 = scalar_lea.vmem %s2137_s21, 2048 }
  0x24   : > { %1927 = vmatprep.subr.mxu1 %v646_v11  ;;  %1891 = vmatprep.subr.mxu0 %v613_v12  ;;  %v628_v21 = vld [vmem:[%s2976_s2 + $0x158] sm:$0xff]  ;;  %v643_v23 = vld [vmem:[%s2976_s2 + $0x1d0] sm:$0xff]  ;;  %v610_v24 = vld [vmem:[%s2976_s2 + $0xc8] sm:$0xff] }
  0x25   : > { %1928 = vmatpush3.msra.mxu1 %v630_v13  ;;  %1892 = vmatpush3.msra.mxu0 %v597_v14  ;;  %v627_v25 = vld [vmem:[%s2976_s2 + $0x150] sm:$0xff]  ;;  %v594_v26 = vld [vmem:[%s2976_s2 + $0x48] sm:$0xff]  ;;  %v609_v28 = vld [vmem:[%s2976_s2 + $0xc0] sm:$0xff] }
  0x26   : > { %1929 = vmatprep.subr.mxu1 %v645_v15  ;;  %1893 = vmatprep.subr.mxu0 %v612_v16  ;;  %v642_v27 = vld [vmem:[%s2976_s2 + $0x1c8] sm:$0xff]  ;;  %v593_v30 = vld [vmem:[%s2976_s2 + $0x40] sm:$0xff]  ;;  %v608_v32 = vld [vmem:[%s2976_s2 + $0xb8] sm:$0xff] }
  0x27   : > { %1930 = vmatpush3.msra.mxu1 %v629_v17  ;;  %1894 = vmatpush3.msra.mxu0 %v596_v18  ;;  %v626_v29 = vld [vmem:[%s2976_s2 + $0x148] sm:$0xff]  ;;  %v641_v31 = vld [vmem:[%s2976_s2 + $0x1c0] sm:$0xff]  ;;  %v592_v34 = vld [vmem:[%s2976_s2 + $0x38] sm:$0xff] }
  0x28   : > { %1931 = vmatprep.subr.mxu1 %v644_v19  ;;  %1895 = vmatprep.subr.mxu0 %v611_v20  ;;  %v625_v33 = vld [vmem:[%s2976_s2 + $0x140] sm:$0xff]  ;;  %v640_v35 = vld [vmem:[%s2976_s2 + $0x1b8] sm:$0xff]  ;;  %v607_v36 = vld [vmem:[%s2976_s2 + $0xb0] sm:$0xff] }
  0x29   : > { %1932 = vmatpush3.msra.mxu1 %v628_v21  ;;  %1896 = vmatpush3.msra.mxu0 %v595_v22  ;;  %v624_v37 = vld [vmem:[%s2976_s2 + $0x138] sm:$0xff]  ;;  %v591_v38 = vld [vmem:[%s2976_s2 + $0x30] sm:$0xff]  ;;  %v606_v40 = vld [vmem:[%s2976_s2 + $0xa8] sm:$0xff] }
  0x2a   : > { %1933 = vmatprep.subr.mxu1 %v643_v23  ;;  %1897 = vmatprep.subr.mxu0 %v610_v24  ;;  %v639_v39 = vld [vmem:[%s2976_s2 + $0x1b0] sm:$0xff]  ;;  %v590_v42 = vld [vmem:[%s2976_s2 + $0x28] sm:$0xff]  ;;  %v605_v43 = vld [vmem:[%s2976_s2 + $0xa0] sm:$0xff] }
  0x2b   : > { %1934 = vmatpush3.msra.mxu1 %v627_v25  ;;  %1898 = vmatpush3.msra.mxu0 %v594_v26  ;;  %v623_v41 = vld [vmem:[%s2976_s2 + $0x130] sm:$0xff]  ;;  %v638_v44 = vld [vmem:[%s2976_s2 + $0x1a8] sm:$0xff]  ;;  %v589_v46 = vld [vmem:[%s2976_s2 + $0x20] sm:$0xff] }
  0x2c   : > { %1935 = vmatprep.subr.mxu1 %v642_v27  ;;  %1899 = vmatprep.subr.mxu0 %v609_v28  ;;  %v622_v45 = vld [vmem:[%s2976_s2 + $0x128] sm:$0xff]  ;;  %v637_v47 = vld [vmem:[%s2976_s2 + $0x1a0] sm:$0xff]  ;;  %v604_v48 = vld [vmem:[%s2976_s2 + $0x98] sm:$0xff] }
  0x2d   : > { %1936 = vmatpush3.msra.mxu1 %v626_v29  ;;  %1900 = vmatpush3.msra.mxu0 %v593_v30  ;;  %v588_v49 = vld [vmem:[%s2976_s2 + $0x18] sm:$0xff]  ;;  %v621_v50 = vld [vmem:[%s2976_s2 + $0x120] sm:$0xff]  ;;  %v603_v52 = vld [vmem:[%s2976_s2 + $0x90] sm:$0xff] }
  0x2e   : > { %1937 = vmatprep.subr.mxu1 %v641_v31  ;;  %1901 = vmatprep.subr.mxu0 %v608_v32  ;;  %v636_v51 = vld [vmem:[%s2976_s2 + $0x198] sm:$0xff]  ;;  %v587_v54 = vld [vmem:[%s2976_s2 + $0x10] sm:$0xff]  ;;  %v602_v56 = vld [vmem:[%s2976_s2 + $0x88] sm:$0xff] }
  0x2f   : > { %1938 = vmatpush3.msra.mxu1 %v625_v33  ;;  %1902 = vmatpush3.msra.mxu0 %v592_v34  ;;  %v620_v53 = vld [vmem:[%s2976_s2 + $0x118] sm:$0xff]  ;;  %v635_v55 = vld [vmem:[%s2976_s2 + $0x190] sm:$0xff]  ;;  %v586_v58 = vld [vmem:[%s2976_s2 + $0x8] sm:$0xff] }
  0x30   : > { %1939 = vmatprep.subr.mxu1 %v640_v35  ;;  %1903 = vmatprep.subr.mxu0 %v607_v36  ;;  %v619_v57 = vld [vmem:[%s2976_s2 + $0x110] sm:$0xff]  ;;  %v634_v59 = vld [vmem:[%s2976_s2 + $0x188] sm:$0xff]  ;;  %v2104_v60 = vld [vmem:[%s2516_s11 + $0x4] ss:$24 sps:$4 sm:$0xff]  }
  0x31   : > { %1940 = vmatpush3.msra.mxu1 %v624_v37  ;;  %1904 = vmatpush3.msra.mxu0 %v591_v38  ;;  %v601_v61 = vld [vmem:[%s2976_s2 + $0x80] sm:$0xff]  ;;  %v618_v0 = vld [vmem:[%s2976_s2 + $0x108] sm:$0xff]  ;;  %v680_v2 = vld [vmem:[%s2976_s2 + $0x2f8] sm:$0xff] }
  0x32   : > { %1941 = vmatprep.subr.mxu1 %v639_v39  ;;  %1905 = vmatprep.subr.mxu0 %v606_v40  ;;  %v585_v62 = vld [vmem:[%s2976_s2] sm:$0xff]  ;;  %v664_v7 = vld [vmem:[%s2976_s2 + $0x278] sm:$0xff]  ;;  %v679_v8 = vld [vmem:[%s2976_s2 + $0x2f0] sm:$0xff] }
  0x33   : > { %1942 = vmatpush3.msra.mxu1 %v623_v41  ;;  %1906 = vmatpush3.msra.mxu0 %v590_v42  ;;  %v2102_v63 = vld [vmem:[%s2516_s11] ss:$24 sps:$4 sm:$0xff]   ;;  %v2107_v5 = vld [vmem:[%s2516_s11 + $0xc] ss:$24 sps:$4 sm:$0xff]   ;;  %v663_v9 = vld [vmem:[%s2976_s2 + $0x270] sm:$0xff] }
  0x34   : > { %1943 = vmatprep.subr.mxu1 %v638_v44  ;;  %1907 = vmatprep.subr.mxu0 %v605_v43  ;;  %v633_v1 = vld [vmem:[%s2976_s2 + $0x180] sm:$0xff]  ;;  %v2108_v10 = vld [vmem:[%s2516_s11 + $0x34] ss:$24 sps:$4 sm:$0xff]   ;;  %v2110_v11 = vld [vmem:[%s2516_s11 + $0x30] ss:$24 sps:$4 sm:$0xff]  }
  0x35   : > { %1944 = vmatpush3.msra.mxu1 %v622_v45  ;;  %1908 = vmatpush3.msra.mxu0 %v589_v46  ;;  %v617_v3 = vld [vmem:[%s2976_s2 + $0x100] sm:$0xff]  ;;  %v678_v12 = vld [vmem:[%s2976_s2 + $0x2e8] sm:$0xff]  ;;  %v2111_v13 = vld [vmem:[%s2516_s11 + $0x3c] ss:$24 sps:$4 sm:$0xff]  }
  0x36   : > { %1945 = vmatprep.subr.mxu1 %v637_v47  ;;  %1909 = vmatprep.subr.mxu0 %v604_v48  ;;  %v2105_v4 = vld [vmem:[%s2516_s11 + $0x8] ss:$24 sps:$4 sm:$0xff]   ;;  %v2113_v15 = vld [vmem:[%s2516_s11 + $0x38] ss:$24 sps:$4 sm:$0xff]   ;;  %v2116_v18 = vld [vmem:[%s2516_s11 + $0x14] ss:$24 sps:$4 sm:$0xff]  }
  0x37   : > { %1946 = vmatpush3.msra.mxu1 %v621_v50  ;;  %1910 = vmatpush3.msra.mxu0 %v588_v49  ;;  %v662_v14 = vld [vmem:[%s2976_s2 + $0x268] sm:$0xff]  ;;  %v677_v16 = vld [vmem:[%s2976_s2 + $0x2e0] sm:$0xff]  ;;  %v676_v19 = vld [vmem:[%s2976_s2 + $0x2d8] sm:$0xff] }
  0x38   : > { %1947 = vmatprep.subr.mxu1 %v636_v51  ;;  %1911 = vmatprep.subr.mxu0 %v603_v52  ;;  %v661_v17 = vld [vmem:[%s2976_s2 + $0x260] sm:$0xff]  ;;  %v660_v20 = vld [vmem:[%s2976_s2 + $0x258] sm:$0xff]  ;;  %v958_v21 = vld [vmem:[%s2613_s28 + $0xc] sm:$0xf] }
  0x39   : > { %1948 = vmatpush3.msra.mxu1 %v620_v53  ;;  %1912 = vmatpush3.msra.mxu0 %v587_v54  ;;  %v675_v22 = vld [vmem:[%s2976_s2 + $0x2d0] sm:$0xff]  ;;  %v955_v23 = vld [vmem:[%s2613_s28] sm:$0xf]  ;;  %v674_v25 = vld [vmem:[%s2976_s2 + $0x2c8] sm:$0xff]  ;;  %v993_v37 = vsub.f32 1.0, %v958_v21 }
  0x3a   : > { %1949 = vmatprep.subr.mxu1 %v635_v55  ;;  %1913 = vmatprep.subr.mxu0 %v602_v56  ;;  %v659_v24 = vld [vmem:[%s2976_s2 + $0x250] sm:$0xff]  ;;  %v990_v26 = vsub.f32 1.0, %v955_v23  ;;  %v658_v27 = vld [vmem:[%s2976_s2 + $0x248] sm:$0xff]  ;;  %v673_v28 = vld [vmem:[%s2976_s2 + $0x2c0] sm:$0xff] }
  0x3b   : > { %1950 = vmatpush3.msra.mxu1 %v619_v57  ;;  %1914 = vmatpush3.msra.mxu0 %v586_v58  ;;  %v956_v6 = vld [vmem:[%s2613_s28 + $0x4] sm:$0xf]  ;;  %v672_v30 = vld [vmem:[%s2976_s2 + $0x2b8] sm:$0xff]  ;;  %v671_v33 = vld [vmem:[%s2976_s2 + $0x2b0] sm:$0xff] }
  0x3c   : > { %1951 = vmatprep.subr.mxu1 %v634_v59  ;;  %1915 = vmatprep.subr.mxu0 %v601_v61  ;;  %v657_v29 = vld [vmem:[%s2976_s2 + $0x240] sm:$0xff]  ;;  %v991_v31 = vsub.f32 1.0, %v956_v6  ;;  %v656_v32 = vld [vmem:[%s2976_s2 + $0x238] sm:$0xff]  ;;  %v957_v34 = vld [vmem:[%s2613_s28 + $0x8] sm:$0xf]  ;;  %s570_s28 = scalar_lea.vmem %s2989_s15, %s1850_s18  ;;  %s2855_s18 = scalar_lea.vmem [#allocation4], %s1846_s20 }
  0x3d   : > { %788 = vmatprep.mubr.f32.mxu0 %v2104_v60  ;;  %1916 = vmatpush3.msra.mxu0 %v585_v62  ;;  %v655_v35 = vld [vmem:[%s2976_s2 + $0x230] sm:$0xff]  ;;  %v670_v36 = vld [vmem:[%s2976_s2 + $0x2a8] sm:$0xff]  ;;  %v992_v39 = vsub.f32 1.0, %v957_v34  ;;  %v669_v40 = vld [vmem:[%s2976_s2 + $0x2a0] sm:$0xff]  ;;  %s1710_s30 = sshll.u32 %s2855_s18, 4  ;;  %s2893_s30 = int_to_ptr.vmem [resolvable:$true] %s1710_s30 }
  0x3e   : > { %1952 = vmatpush3.msra.mxu1 %v618_v0  ;;  %789 = vmatmul.mubr.f32.vlgmr.msra.gmra.mxu0 %v2102_v63  ;;  %v654_v38 = vld [vmem:[%s2976_s2 + $0x228] sm:$0xff]  ;;  %v653_v41 = vld [vmem:[%s2976_s2 + $0x220] sm:$0xff]  ;;  %v668_v42 = vld [vmem:[%s2976_s2 + $0x298] sm:$0xff]  ;;  %s2132_s17 = scalar_lea.vmem %s2893_s30, 1024  ;;  %p2139_p0 = scmp.lt.s32.totalorder %s2893_s30, %s2137_s21 }
  0x3f   : > { %1953 = vmatprep.subr.mxu1 %v633_v1  ;;  %1961 = vmatprep.subr.mxu0 %v680_v2  ;;  %v652_v43 = vld [vmem:[%s2976_s2 + $0x218] sm:$0xff]  ;;  %v667_v44 = vld [vmem:[%s2976_s2 + $0x290] sm:$0xff]  ;;  %v666_v46 = vld [vmem:[%s2976_s2 + $0x288] sm:$0xff]  ;;  %p2133_p11 = scmp.ne.s32.totalorder %s2893_s30, %s2132_s17  ;;  %p2140_p1 = scmp.lt.s32.totalorder %s2138_s26, %s2132_s17 }
  0x40   : > { %1954 = vmatpush3.msra.mxu1 %v617_v3  ;;  %863 = vmatprep.mubr.f32.mxu1 %v2107_v5  ;;  %v651_v45 = vld [vmem:[%s2976_s2 + $0x210] sm:$0xff]  ;;  %v650_v47 = vld [vmem:[%s2976_s2 + $0x208] sm:$0xff]  ;;  %v665_v48 = vld [vmem:[%s2976_s2 + $0x280] sm:$0xff] }
  0x41   : > { %1962 = vmatpush3.msra.mxu0 %v664_v7  ;;  %864 = vmatmul.mubr.f32.vlgmr.msra.gmra.mxu1 %v2105_v4  ;;  %v649_v49 = vld [vmem:[%s2976_s2 + $0x200] sm:$0xff]  ;;  %v2114_v50 = vld [vmem:[%s2516_s11 + $0x10] ss:$24 sps:$4 sm:$0xff]   ;;  %v2702_v53 = vld [vmem:[%s2980_s6 + $0x18] sm:$0xff]  ;;  %p2134_p12 = pnand %p2133_p11, %p2356_p5  ;;  %p2141_p2 = por %p2140_p1, %p2139_p0 }
  0x42   : > { %1963 = vmatprep.subr.mxu0 %v679_v8  ;;  %793 = vmatprep.mubr.f32.mxu0 %v2108_v10  ;;  %v2117_v51 = vld [vmem:[%s2516_s11 + $0x44] ss:$24 sps:$4 sm:$0xff]   ;;  %v2119_v52 = vld [vmem:[%s2516_s11 + $0x40] ss:$24 sps:$4 sm:$0xff]   ;;  %v2709_v54 = vld [vmem:[%s2980_s6 + $0x10] sm:$0xff]  ;;  %s1884_s11 = sshll.u32 %s2339_s25, 10 }
  0x43   : > { %1964 = vmatpush3.msra.mxu0 %v663_v9  ;;  %868 = vmatprep.mubr.f32.mxu1 %v2111_v13  ;;  %v2716_v55 = vld [vmem:[%s2980_s6 + $0x8] sm:$0xff]  ;;  %v2723_v56 = vld [vmem:[%s2980_s6] sm:$0xff]  ;;  %s2890_s20 = scalar_lea.hbm %s2990_s16, %s1884_s11  ;;  %p2135_p13 = pneg %p2134_p12 }
  0x44   : > { %1965 = vmatprep.subr.mxu0 %v678_v12  ;;  %794 = vmatmul.mubr.f32.gmra.mxu0 %v2110_v11  ;;  %v1853_v1 = vld [vmem:[%s2977_s3] ss:$0 sm:$0xff] }
  0x45   : > { %1966 = vmatpush3.msra.mxu0 %v662_v14  ;;  %869 = vmatmul.mubr.f32.gmra.mxu1 %v2113_v15  ;;  %p2142_p3 = pnand %p2141_p2, %p2135_p13 }
  0x46   : > { %1967 = vmatprep.subr.mxu0 %v677_v16  ;;  %938 = vmatprep.mubr.f32.mxu0 %v2116_v18 }
  0x47   : > { %1968 = vmatpush3.msra.mxu0 %v661_v17  ;;  %977 = vperm.xlu1 %2101, %v958_v21  }
  0x48   : > { %1969 = vmatprep.subr.mxu0 %v676_v19  ;;  %962 = vperm.xlu0 %2100, %v955_v23  }
  0x49   : > { %1970 = vmatpush3.msra.mxu0 %v660_v20  ;;  %2015 = vmatprep.subr.mxu1 %v2702_v53  ;;  %v1854_v20 = vld [vmem:[%s2978_s4] ss:$0 sm:$0xff] }
  0x4a   : > { %1971 = vmatprep.subr.mxu0 %v675_v22  ;;  %2016 = vmatpush3.msra.mxu1 %v2702_v53 }
  0x4b   : > { %1972 = vmatpush3.msra.mxu0 %v659_v24  ;;  %996 = vperm.xlu1 %2101, %v990_v26  }
  0x4c   : > { %1973 = vmatprep.subr.mxu0 %v674_v25  ;;  %967 = vperm.xlu0 %2100, %v956_v6  }
  0x4d   : > { %1974 = vmatpush3.msra.mxu0 %v658_v27  ;;  %2017 = vmatprep.subr.mxu1 %v2709_v54 }
  0x4e   : > { %1975 = vmatprep.subr.mxu0 %v673_v28  ;;  %2018 = vmatpush3.msra.mxu1 %v2709_v54 }
  0x4f   : > { %1976 = vmatpush3.msra.mxu0 %v657_v29  ;;  %1001 = vperm.xlu1 %2101, %v991_v31  }
  0x50   : > { %1977 = vmatprep.subr.mxu0 %v672_v30  ;;  %972 = vperm.xlu0 %2100, %v957_v34  }
  0x51   : > { %1978 = vmatpush3.msra.mxu0 %v656_v32  ;;  %2019 = vmatprep.subr.mxu1 %v2716_v55 }
  0x52   : > { %1979 = vmatprep.subr.mxu0 %v671_v33  ;;  %2020 = vmatpush3.msra.mxu1 %v2716_v55 }
  0x53   : > { %1980 = vmatpush3.msra.mxu0 %v655_v35  ;;  %1011 = vperm.xlu1 %2101, %v993_v37  }
  0x54   : > { %1981 = vmatprep.subr.mxu0 %v670_v36  ;;  %1006 = vperm.xlu0 %2100, %v992_v39  }
  0x55   : > { %1982 = vmatpush3.msra.mxu0 %v654_v38  ;;  %2021 = vmatprep.subr.mxu1 %v2723_v56 }
  0x56   : > { %1983 = vmatprep.subr.mxu0 %v669_v40  ;;  %2022 = vmatpush3.msra.mxu1 %v2723_v56 }
  0x57   : > { %1984 = vmatpush3.msra.mxu0 %v653_v41 }
  0x58   : > { %1985 = vmatprep.subr.mxu0 %v668_v42 }
  0x59   : > { %1986 = vmatpush3.msra.mxu0 %v652_v43  ;;  %v2738_v43 = vld [vmem:[%s2981_s7] ss:$0 sm:$0xff] }
  0x5a   : > { %1987 = vmatprep.subr.mxu0 %v667_v44 }
  0x5b   : > { %1988 = vmatpush3.msra.mxu0 %v651_v45 }
  0x5c   : > { %1989 = vmatprep.subr.mxu0 %v666_v46 }
  0x5d   : > { %1990 = vmatpush3.msra.mxu0 %v650_v47 }
  0x5e   : > { %1991 = vmatprep.subr.mxu0 %v665_v48 }
  0x5f   : > { %1992 = vmatpush3.msra.mxu0 %v649_v49 }
  0x60   : > { %939 = vmatmul.mubr.f32.vlgmr.msra.gmra.mxu0 %v2114_v50 }
  0x61   : > { %943 = vmatprep.mubr.f32.mxu0 %v2117_v51 }
  0x64   : > { %944 = vmatmul.mubr.f32.gmra.mxu0 %v2119_v52 }
  0xc2   : > { %v978_v62 = vpop.permute.xlu1 %977 }
  0xc3   : > { %v963_v60 = vpop.permute.xlu0 %962  ;;  %v989_v36 = vmul.f32 %v1854_v20, %v978_v62 }
  0xc4   : > { %v986_v27 = vmul.f32 %v1854_v20, %v963_v60 }
  0xc6   : > { %v997_v8 = vpop.permute.xlu1 %996 }
  0xc7   : > { %v968_v4 = vpop.permute.xlu0 %967 }
  0xc8   : > { %v987_v28 = vmul.f32 %v1854_v20, %v968_v4 }
  0xca   : > { %v1002_v21 = vpop.permute.xlu1 %1001 }
  0xcb   : > { %v973_v17 = vpop.permute.xlu0 %972 }
  0xcc   : > { %v988_v37 = vmul.f32 %v1854_v20, %v973_v17  ;;  %v1205_v20 = vld [vmem:[%s2986_s12 + $0x60] sm:$0xff] }
  0xce   : > { %v1012_v35 = vpop.permute.xlu1 %1011 }
  0xcf   : > { %v1007_v30 = vpop.permute.xlu0 %1006 }
  0xfe   : > { %v1917_v57 = vpop.f32.mrf.mxu0 }
 0x100   : > { %v1918_v58 = vpop.f32.mrf.mxu0 }
 0x101   : > { %v1955_v59 = vpop.f32.mrf.mxu1  ;;  %v1919_v0 = vadd.f32 %v1918_v58, %v1917_v57 }
 0x103   : > { %v1956_v63 = vpop.f32.mrf.mxu1  ;;  %v791_v5 = vadd.f32 %v1919_v0, %v1853_v1 }
 0x104   : > { %v1920_v61 = vpop.f32.mrf.mxu0  ;;  %v1957_v7 = vadd.f32 %v1956_v63, %v1955_v59 }
 0x105   : > { %v1958_v3 = vpop.f32.mrf.mxu1 }
 0x106   : > { %v1921_v2 = vpop.f32.mrf.mxu0  ;;  %v866_v13 = vadd.f32 %v1957_v7, %v791_v5 }
 0x107   : > { %v1922_v9 = vadd.f32 %v1921_v2, %v1920_v61  ;;  %v1959_v10 = vpop.f32.mrf.mxu1 }
 0x108   : > { %v1960_v15 = vadd.f32 %v1959_v10, %v1958_v3 }
 0x109   : > { %v796_v14 = vadd.f32 %v1922_v9, %v1853_v1 }
 0x10b   : > { %v871_v23 = vadd.f32 %v1960_v15, %v796_v14 }
 0x120   : > { %v1993_v11 = vpop.f32.mrf.mxu0 }
 0x122   : > { %v1994_v12 = vpop.f32.mrf.mxu0 }
 0x123   : > { %v1995_v16 = vadd.f32 %v1994_v12, %v1993_v11 }
 0x124   : > { %v1996_v18 = vpop.f32.mrf.mxu0 }
 0x125   : > { %v941_v19 = vadd.f32 %v1995_v16, %v866_v13 }
 0x126   : > { %v1997_v22 = vpop.f32.mrf.mxu0 }
 0x127   : > { %v951_v24 = vcombine.high %v941_v19, %v941_v19  ;;  %v1014_v25 = vmul.f32 %v997_v8, %v941_v19  ;;  %v1998_v26 = vadd.f32 %v1997_v22, %v1996_v18  ;;  %v1206_v19 = vld [vmem:[%s2986_s12 + $0x68] sm:$0xff]  ;;  %v1201_v22 = vld [vmem:[%s2986_s12 + $0x40] sm:$0xff] }
 0x128   : > { %1259 = vmatprep.subr.mxu1 %v1206_v19 }
 0x129   : > { %v1015_v6 = vmul.f32 %v1002_v21, %v951_v24  ;;  %v946_v29 = vadd.f32 %v1998_v26, %v871_v23  ;;  %v1018_v31 = vadd.f32 %v1014_v25, %v986_v27  ;;  %v1202_v21 = vld [vmem:[%s2986_s12 + $0x48] sm:$0xff]  ;;  %v1197_v24 = vld [vmem:[%s2986_s12 + $0x20] sm:$0xff]  ;;  %v2225_v26 = vmov 0.0  }
 0x12a   : > { %v1198_v23 = vld [vmem:[%s2986_s12 + $0x28] sm:$0xff]  ;;  %v1193_v27 = vld [vmem:[%s2986_s12] sm:$0xff]  ;;  %2037 = vmatprep.subr.mxu0 %v2225_v26  ;;  %2045 = vmatprep.mubr.msk.f32.mxu0 %vm2226_vm1, %v2225_v26 }
 0x12b   : > { %v1019_v32 = vadd.f32 %v1015_v6, %v987_v28  ;;  %v952_v33 = vcombine.high %v946_v29, %v946_v29  ;;  %v1016_v34 = vmul.f32 %v1007_v30, %v946_v29  ;;  %v1194_v25 = vld [vmem:[%s2986_s12 + $0x8] sm:$0xff]  ;;  %v1208_v28 = vld [vmem:[%s2986_s12 + $0x78] sm:$0xff] }
 0x12d   : > { %v1017_v38 = vmul.f32 %v1012_v35, %v952_v33  ;;  %v1037_v39 = vcombine.low %v1018_v31, %v1019_v32  ;;  %v1020_v40 = vadd.f32 %v1016_v34, %v988_v37  ;;  %v2780_v35 = vld [vmem:[%s2982_s8] ss:$0 sm:$0xff] }
 0x12e   : > { %v2785_v37 = vld [vmem:[%s2983_s9] ss:$0 sm:$0xff] }
 0x12f   : > { %v1021_v41 = vadd.f32 %v1017_v38, %v989_v36  ;;  %2023 = vmatprep.mubr.msk.f32.mxu1 %vm1039_vm0, %v1037_v39 }
 0x131   : > { %v1038_v42 = vcombine.low %v1020_v40, %v1021_v41  ;;  %v1207_v41 = vld [vmem:[%s2986_s12 + $0x70] sm:$0xff] }
 0x133   : > { %2024 = vmatmul.mubr.msk.f32.vlgmr.msra.gmra.mxu1 %vm1039_vm0, %v1038_v42 }
 0x134   : > { %1260 = vmatpush1.msra.mxu1 %v1205_v20  ;;  %1299 = vmatprep.mubr.f32.mxu1 %v2225_v26 }
 0x135   : > { %1261 = vmatprep.subr.mxu1 %v1202_v21 }
 0x136   : > { %1262 = vmatpush1.msra.mxu1 %v1201_v22 }
 0x137   : > { %1263 = vmatprep.subr.mxu1 %v1198_v23 }
 0x138   : > { %1264 = vmatpush1.msra.mxu1 %v1197_v24 }
 0x139   : > { %1265 = vmatprep.subr.mxu1 %v1194_v25 }
 0x13a   : > { %1266 = vmatpush1.msra.mxu1 %v1193_v27 }
 0x13b   : > { %1336 = vmatprep.subr.mxu1 %v1208_v28 }
 0x1f3   : > { %v2025_v44 = vpop.f32.mrf.mxu1 }
 0x1f4   : > { %v1116_v45 = vadd.f32 %v2025_v44, %v2738_v43  ;;  %v1204_v44 = vld [vmem:[%s2986_s12 + $0x58] sm:$0xff] }
 0x1f5   : > { %v1110_v46 = vpop.f32.mrf.mxu1 }
 0x1f6   : > { %v1120_v47 = vmul.f32 %v1116_v45, %v1116_v45  ;;  %v1111_v48 = vadd.f32 %v2738_v43, %v1110_v46  ;;  %v1203_v46 = vld [vmem:[%s2986_s12 + $0x50] sm:$0xff] }
 0x1f8   : > { %v1122_v49 = vmul.f32 %v1120_v47, %v1116_v45  ;;  %v1119_v50 = vmul.f32 %v1111_v48, %v1111_v48 }
 0x1fa   : > { %v1124_v51 = vmul.f32 0.044715, %v1122_v49  ;;  %v1121_v52 = vmul.f32 %v1119_v50, %v1111_v48  ;;  %v1199_v50 = vld [vmem:[%s2986_s12 + $0x30] sm:$0xff] }
 0x1fc   : > { %v1126_v57 = vadd.f32 %v1124_v51, %v1116_v45  ;;  %v1123_v58 = vmul.f32 0.044715, %v1121_v52  ;;  %v1196_v51 = vld [vmem:[%s2986_s12 + $0x18] sm:$0xff] }
 0x1fe   : > { %v1125_v59 = vadd.f32 %v1123_v58, %v1111_v48  ;;  %v1128_v60 = vmul.f32 0.7978846, %v1126_v57  ;;  %v1195_v57 = vld [vmem:[%s2986_s12 + $0x10] sm:$0xff] }
 0x200   : > { %2120 = vtanh.f32 %v1128_v60  ;;  %v1127_v61 = vmul.f32 0.7978846, %v1125_v59  ;;  %v1209_v60 = vld [vmem:[%s2987_s13] sm:$0xf] }
 0x202   : > { %2122 = vtanh.f32 %v1127_v61 }
 0x20d   : > { %v2121_v62 = vpop.eup %2120 }
 0x20e   : > { %v1132_v63 = vadd.f32 1.0, %v2121_v62 }
 0x20f   : > { %v2123_v0 = vpop.eup %2122 }
 0x210   : > { %v1134_v1 = vmul.f32 0.5, %v1132_v63  ;;  %v1131_v2 = vadd.f32 1.0, %v2123_v0 }
 0x212   : > { %v1136_v3 = vmul.f32 %v1134_v1, %v1116_v45  ;;  %v1133_v4 = vmul.f32 0.5, %v1131_v2 }
 0x214   : > { %v1140_v5 = vsel %vm1039_vm0, %v1136_v3, 0.0  ;;  %v1135_v7 = vmul.f32 %v1133_v4, %v1111_v48  ;;  %v1200_v48 = vld [vmem:[%s2986_s12 + $0x38] sm:$0xff] }
 0x215   : > { %1141 = vadd.xlane.f32.xlu1 %v1140_v5 }
 0x216   : > { %v1137_v8 = vsel %vm1039_vm0, %v1135_v7, 0.0 }
 0x217   : > { %1138 = vadd.xlane.f32.xlu0 %v1137_v8 }
 0x29e   : > { %v1142_v9 = vpop.xlane.xlu1 %1141 }
 0x29f   : > { %v1145_v10 = vmul.f32 0.03125, %v1142_v9 }
 0x2a0   : > { %v1139_v11 = vpop.xlane.xlu0 %1138 }
 0x2a1   : > { %v1144_v12 = vmul.f32 0.03125, %v1139_v11  ;;  %v1147_v13 = vsub.f32 %v1136_v3, %v1145_v10 }
 0x2a3   : > { %v1146_v14 = vsub.f32 %v1135_v7, %v1144_v12  ;;  %v1149_v17 = vmul.f32 %v1147_v13, %v1147_v13 }
 0x2a5   : > { %v1148_v15 = vmul.f32 %v1146_v14, %v1146_v14  ;;  %v1153_v18 = vsel %vm1039_vm0, %v1149_v17, 0.0 }
 0x2a7   : > { %v1150_v16 = vsel %vm1039_vm0, %v1148_v15, 0.0 }
 0x2a8   : > { %1151 = vadd.xlane.f32.xlu0 %v1150_v16 }
 0x2ac   : > { %1154 = vadd.xlane.f32.xlu0 %v1153_v18 }
 0x331   : > { %v1152_v6 = vpop.xlane.xlu0 %1151 }
 0x332   : > { %v1156_v29 = vmul.f32 0.03125, %v1152_v6 }
 0x334   : > { %v1158_v30 = vadd.f32 1e-05, %v1156_v29 }
 0x335   : > { %v1155_v31 = vpop.xlane.xlu0 %1154 }
 0x336   : > { %2124 = vrsqrt.f32 %v1158_v30  ;;  %v1157_v32 = vmul.f32 0.03125, %v1155_v31 }
 0x338   : > { %v1159_v33 = vadd.f32 1e-05, %v1157_v32 }
 0x33a   : > { %2126 = vrsqrt.f32 %v1159_v33 }
 0x343   : > { %v2125_v34 = vpop.eup %2124 }
 0x344   : > { %v1162_v36 = vmul.f32 %v2125_v34, %v1146_v14 }
 0x346   : > { %v1171_v38 = vmul.f32 %v2780_v35, %v1162_v36 }
 0x347   : > { %v2127_v39 = vpop.eup %2126 }
 0x348   : > { %v1180_v40 = vadd.f32 %v2785_v37, %v1171_v38  ;;  %v1163_v42 = vmul.f32 %v2127_v39, %v1147_v13 }
 0x34a   : > { %v1184_v45 = vcombine.high %v1180_v40, %v1180_v40  ;;  %1860 = vmatmul.mubr.msk.f32.vlgmr.msra.gmra.mxu1 %vm1039_vm0, %v1180_v40  ;;  %v1172_v47 = vmul.f32 %v2780_v35, %v1163_v42  ;;  %1189 = vst.msk [vmem:[%s570_s28] sm:$0xf] %vm1188_vm2, %v1180_v40 }
 0x34b   : > { %1337 = vmatpush1.msra.mxu1 %v1207_v41  ;;  %1305 = vmatprep.mubr.f32.mxu1 %v2225_v26 }
 0x34c   : > { %1338 = vmatprep.subr.mxu1 %v1204_v44  ;;  %v1181_v49 = vadd.f32 %v2785_v37, %v1172_v47  ;;  %1190 = vst.msk [vmem:[%s570_s28 + $0x4] sm:$0xf] %vm1188_vm2, %v1184_v45  ;;  %v1551_v47 = vld [vmem:[%s2984_s10 + $0x18] sm:$0xff] }
 0x34d   : > { %1339 = vmatpush1.msra.mxu1 %v1203_v46  ;;  %2038 = vmatpush3.msra.mxu0 %v1551_v47 }
 0x34e   : > { %1340 = vmatprep.subr.mxu1 %v1200_v48  ;;  %v1185_v52 = vcombine.high %v1181_v49, %v1181_v49  ;;  %1861 = vmatmul.mubr.msk.f32.gmra.mxu1 %vm1039_vm0, %v1181_v49  ;;  %1191 = vst.msk [vmem:[%s570_s28 + $0x8] sm:$0xf] %vm1188_vm2, %v1181_v49  ;;  %v1550_v48 = vld [vmem:[%s2984_s10 + $0x10] sm:$0xff] }
 0x34f   : > { %1341 = vmatpush1.msra.mxu1 %v1199_v50  ;;  %1376 = vmatprep.mubr.f32.mxu1 %v2225_v26  ;;  %v1548_v50 = vld [vmem:[%s2984_s10] sm:$0xff] }
 0x350   : > { %1342 = vmatprep.subr.mxu1 %v1196_v51  ;;  %1192 = vst.msk [vmem:[%s570_s28 + $0xc] sm:$0xf] %vm1188_vm2, %v1185_v52  ;;  %2039 = vmatprep.subr.mxu0 %v2225_v26 }
 0x351   : > { %1343 = vmatpush1.msra.mxu1 %v1195_v57  ;;  %2040 = vmatpush3.msra.mxu0 %v1550_v48 }
 0x352   : > { %2026 = vmatprep.subr.mxu1 %v2225_v26  ;;  %1862 = vmatmul.mubr.msk.f32.vlgmr.msra.gmra.mxu1 %vm1039_vm0, %v1180_v40 }
 0x353   : > { %2027 = vmatpush3.msra.mxu1 %v2702_v53  ;;  %1382 = vmatprep.mubr.f32.mxu1 %v2225_v26  ;;  %v1864_v53 = vld [vmem:[%s2979_s5] ss:$0 sm:$0xff] }
 0x354   : > { %2028 = vmatprep.subr.mxu1 %v2225_v26  ;;  %2041 = vmatprep.subr.mxu0 %v2225_v26 }
 0x355   : > { %2029 = vmatpush3.msra.mxu1 %v2709_v54  ;;  %v1211_v54 = vlaneseq }
 0x356   : > { %2030 = vmatprep.subr.mxu1 %v2225_v26  ;;  %1863 = vmatmul.mubr.msk.f32.gmra.mxu1 %vm1039_vm0, %v1181_v49  ;;  %v1549_v49 = vld [vmem:[%s2984_s10 + $0x8] sm:$0xff] }
 0x357   : > { %2031 = vmatpush3.msra.mxu1 %v2716_v55  ;;  %2034 = vmatprep.mubr.msk.f32.mxu1 %vm2226_vm1, %v2225_v26  ;;  %v2842_v58 = vshrl.u32 %v1211_v54, 7 }
 0x358   : > { %2032 = vmatprep.subr.mxu1 %v2225_v26  ;;  %2042 = vmatpush3.msra.mxu0 %v1549_v49 }
 0x359   : > { %2033 = vmatpush3.msra.mxu1 %v2723_v56  ;;  %v1213_v59 = vsub.s32 0, %v2842_v58  ;;  %v1217_v55 = vsub.s32 1, %v2842_v58  ;;  %v1221_v2 = vsub.s32 2, %v2842_v58  ;;  %v1225_v3 = vsub.s32 3, %v2842_v58  ;;  %2043 = vmatprep.subr.mxu0 %v2225_v26 }
 0x35a   : > { %2035 = vmatmul.mubr.msk.f32.vlgmr.msra.gmra.mxu1 %vm1039_vm0, %v1864_v53  ;;  %2044 = vmatpush3.msra.mxu0 %v1548_v50 }
 0x35b   : > { %v1214_v61 = vrot.slane %v1209_v60, %v1213_v59  ;;  %v1218_v62 = vrot.slane %v1209_v60, %v1217_v55  ;;  %v1222_v11 = vrot.slane %v1209_v60, %v1221_v2  ;;  %v1226_v12 = vrot.slane %v1209_v60, %v1225_v3 }
 0x40a   : > { %v1301_v63 = vpop.f32.mrf.mxu1 }
 0x40b   : > { %v1302_v0 = vadd.f32 %v1301_v63, %v1214_v61 }
 0x40c   : > { %v1303_v56 = vpop.f32.mrf.mxu1 }
 0x40d   : > { %v1304_v1 = vadd.f32 %v1303_v56, %v1218_v62 }
 0x40e   : > { %v1307_v4 = vpop.f32.mrf.mxu1 }
 0x40f   : > { %v1397_v5 = vcombine.low %v1302_v0, %v1304_v1  ;;  %v1398_v7 = vcombine.high %v1302_v0, %v1304_v1  ;;  %v1308_v9 = vadd.f32 %v1307_v4, %v1214_v61 }
 0x410   : > { %v1309_v8 = vpop.f32.mrf.mxu1 }
 0x411   : > { %1413 = vst [vmem:[%s2855_s18] sm:$0xff] %v1397_v5  ;;  %1415 = vst [vmem:[%s2855_s18 + $0x10] sm:$0xff] %v1398_v7  ;;  %v1310_v10 = vadd.f32 %v1309_v8, %v1218_v62 }
 0x412   : > { %v1378_v13 = vpop.f32.mrf.mxu1 }
 0x413   : > { %v1401_v14 = vcombine.low %v1308_v9, %v1310_v10  ;;  %v1402_v15 = vcombine.high %v1308_v9, %v1310_v10  ;;  %v1379_v17 = vadd.f32 %v1378_v13, %v1222_v11 }
 0x414   : > { %v1380_v16 = vpop.f32.mrf.mxu1 }
 0x415   : > { %1417 = vst [vmem:[%s2855_s18 + $0x20] sm:$0xff] %v1401_v14  ;;  %1419 = vst [vmem:[%s2855_s18 + $0x30] sm:$0xff] %v1402_v15  ;;  %v1381_v18 = vadd.f32 %v1380_v16, %v1226_v12 }
 0x416   : > { %v1384_v19 = vpop.f32.mrf.mxu1 }
 0x417   : > { %v1399_v20 = vcombine.low %v1379_v17, %v1381_v18  ;;  %v1400_v21 = vcombine.high %v1379_v17, %v1381_v18  ;;  %v1385_v23 = vadd.f32 %v1384_v19, %v1222_v11 }
 0x418   : > { %v1386_v22 = vpop.f32.mrf.mxu1 }
 0x419   : > { %1414 = vst [vmem:[%s2855_s18 + $0x8] sm:$0xff] %v1399_v20  ;;  %1416 = vst [vmem:[%s2855_s18 + $0x18] sm:$0xff] %v1400_v21  ;;  %v1387_v24 = vadd.f32 %v1386_v22, %v1226_v12 }
 0x41a   : > { %v1506_v25 = vpop.f32.mrf.mxu1 }
 0x41b   : > { %v1403_v27 = vcombine.low %v1385_v23, %v1387_v24  ;;  %v1404_v28 = vcombine.high %v1385_v23, %v1387_v24  ;;  %v1507_v6 = vadd.f32 %v2738_v43, %v1506_v25 }
 0x41c   : > { %v2036_v29 = vpop.f32.mrf.mxu1 }
 0x41d   : > { %1418 = vst [vmem:[%s2855_s18 + $0x28] sm:$0xff] %v1403_v27  ;;  %1420 = vst [vmem:[%s2855_s18 + $0x38] sm:$0xff] %v1404_v28  ;;  %v1510_v30 = vmul.f32 %v1507_v6, %v1507_v6 }
 0x41f   : > { %v1511_v31 = vmul.f32 %v1510_v30, %v1507_v6 }
 0x421   : > { %v1512_v32 = vmul.f32 0.044715, %v1511_v31 }
 0x423   : > { %v1513_v33 = vadd.f32 %v1512_v32, %v1507_v6 }
 0x425   : > { %v1514_v34 = vmul.f32 0.7978846, %v1513_v33 }
 0x427   : > { %2128 = vtanh.f32 %v1514_v34 }
 0x434   : > { %v2129_v36 = vpop.eup %2128 }
 0x435   : > { %v1516_v38 = vadd.f32 1.0, %v2129_v36 }
 0x437   : > { %v1517_v39 = vmul.f32 0.5, %v1516_v38 }
 0x439   : > { %v1518_v40 = vmul.f32 %v1517_v39, %v1507_v6 }
 0x43b   : > { %v1519_v41 = vsel %vm1188_vm2, %v1518_v40, 0.0 }
 0x43c   : > { %1520 = vadd.xlane.f32.xlu1 %v1519_v41 }
 0x4c5   : > { %v1521_v42 = vpop.xlane.xlu1 %1520 }
 0x4c6   : > { %v1522_v44 = vmul.f32 0.03125, %v1521_v42 }
 0x4c8   : > { %v1523_v45 = vsub.f32 %v1518_v40, %v1522_v44 }
 0x4ca   : > { %v1524_v43 = vmul.f32 %v1523_v45, %v1523_v45 }
 0x4cc   : > { %v1525_v46 = vsel %vm1188_vm2, %v1524_v43, 0.0 }
 0x4cd   : > { %1526 = vadd.xlane.f32.xlu0 %v1525_v46 }
 0x556   : > { %v1527_v51 = vpop.xlane.xlu0 %1526 }
 0x557   : > { %v1528_v52 = vmul.f32 0.03125, %v1527_v51 }
 0x559   : > { %v1529_v57 = vadd.f32 1e-05, %v1528_v52 }
 0x55b   : > { %2130 = vrsqrt.f32 %v1529_v57 }
 0x568   : > { %v2131_v53 = vpop.eup %2130 }
 0x569   : > { %v1531_v54 = vmul.f32 %v2131_v53, %v1523_v45 }
 0x56b   : > { %v1539_v59 = vmul.f32 %v2780_v35, %v1531_v54 }
 0x56d   : > { %v1547_v55 = vadd.f32 %v2785_v37, %v1539_v59 }
 0x56f   : > { %2046 = vmatmul.mubr.msk.f32.vlgmr.msra.gmra.mxu0 %vm1039_vm0, %v1547_v55 }
 0x570   : > { %2145 = shalt.err (!%p2142_p3)
}
 0x571   : > { %s2146_s18 = scalar_lea.hbm %s2890_s20, 1024  ;;  %s2150_s11 = scalar_lea.hbm %s2990_s16, 5120 }
 0x572   : > { %p2147_p4 = scmp.ne.s32.totalorder %s2890_s20, %s2146_s18  ;;  %p2151_p9 = scmp.lt.s32.totalorder %s2890_s20, %s2990_s16 }
 0x573   : > { %p2152_p10 = scmp.lt.s32.totalorder %s2150_s11, %s2146_s18 }
 0x574   : > { %p2148_p7 = pnand %p2147_p4, %p2356_p5 }
 0x575   : > { %p2153_p11 = por %p2152_p10, %p2151_p9 }
 0x576   : > { %p2149_p8 = pneg %p2148_p7 }
 0x578   : > { %p2154_p12 = pnand %p2153_p11, %p2149_p8 }
 0x57a   : > { %2157 = shalt.err (!%p2154_p12)
}
 0x57b   : > { %s2228_s17 = smov 256   ;;  %s2229_s14 = smov 16   ;;  %v2230_v26 = vmov 1966171168  }
 0x57c   : > { %2050 = dma.vmem_to_hbm [thread:$0]  (%p2356_p5), %s2893_s30, 1024, %s2890_s20, %s1676_s27, %s2228_s17, %s2228_s17, %s2229_s14   ;;  %v1634_v35 = vunpack.c.l.s4 %v2230_v26 }
 0x57d   : > { %s3013_s18 = sld [smem:[#allocation15_spill]]  ;;  %s1845_s24 = sshll.u32 %s2850_s23, 2 }
 0x57e   : > { %v1635_v37 = vunpack.c.0.s8 %v1634_v35  ;;  %s537_s28 = scalar_lea.vmem [#allocation2], %s1845_s24  ;;  %s1882_s20 = sshll.u32 %s2339_s25, 6 }
 0x57f   : > { %s1689_s30 = sshll.u32 %s537_s28, 4  ;;  %s3014_s29 = sld [smem:[#allocation16_spill]]  ;;  %s2930_s30 = int_to_ptr.vmem [resolvable:$true] %s1689_s30 }
 0x580   : > { %v1638_v61 = vsub.s32 %v1635_v37, %v2842_v58  ;;  %s1666_s17 = scalar_lea.sflag [#allocation3], %s2850_s23  ;;  %s2158_s21 = scalar_lea.vmem %s2930_s30, 64 }
 0x581   : > { %p2159_p13 = scmp.ne.s32.totalorder %s2930_s30, %s2158_s21  ;;  %s2231_s25 = smov [#allocation2]  }
 0x582   : > { %s2162_s26 = sshll.u32 %s2231_s25, 4  ;;  %s2163_s26 = int_to_ptr.vmem [resolvable:$false] %s2162_s26 }
 0x583   : > { %v1869_v60 = vld [vmem:[%s3013_s18] ss:$0 sm:$0xff]  ;;  %p2160_p0 = pnand %p2159_p13, %p2356_p5  ;;  %s2164_s18 = scalar_lea.vmem %s2163_s26, 128 }
 0x584   : > { %p2165_p2 = scmp.lt.s32.totalorder %s2930_s30, %s2163_s26  ;;  %p2166_p3 = scmp.lt.s32.totalorder %s2164_s18, %s2158_s21 }
 0x585   : > { %s2928_s19 = scalar_lea.hbm %s3014_s29, %s1882_s20  ;;  %p2161_p1 = pneg %p2160_p0 }
 0x586   : > { %p2167_p4 = por %p2166_p3, %p2165_p2 }
 0x588   : > { %p2168_p7 = pnand %p2167_p4, %p2161_p1 }
 0x62f   : > { %v1628_v62 = vpop.f32.mrf.mxu0 }
 0x630   : > { %v1629_v63 = vadd.f32 %v1869_v60, %v1628_v62 }
 0x631   : > { %v2047_v56 = vpop.f32.mrf.mxu0 }
 0x632   : > { %v1639_v0 = vrot.slane %v1629_v63, %v1638_v61 }
 0x634   : > { %v1640_v1 = vcombine.high %v1639_v0, %v1639_v0  ;;  %v1647_v2 = vrot.slane %v1639_v0, %v1638_v61  ;;  %1871 = vst.sshfl [vmem:[%s537_s28] sm:$0x1 pattern:$0x73625140] %v1639_v0 }
 0x636   : > { %v1654_v3 = vrot.slane %v1640_v1, %v1638_v61  ;;  %v1655_v4 = vcombine.high %v1647_v2, %v1647_v2  ;;  %1872 = vst.sshfl [vmem:[%s537_s28 + $0x1] sm:$0x1 pattern:$0x73625140] %v1640_v1 }
 0x638   : > { %v1656_v58 = vcombine.high %v1654_v3, %v1654_v3  ;;  %1663 = vst [vmem:[%s537_s28 + $0x2] sm:$0x1] %v1655_v4 }
 0x63a   : > { %1664 = vst [vmem:[%s537_s28 + $0x3] sm:$0x1] %v1656_v58 }
 0x63b   : > { %2171 = shalt.err (!%p2168_p7)
}
 0x63c   : > { %s2172_s24 = scalar_lea.hbm %s2928_s19, 64  ;;  %s2176_s27 = scalar_lea.hbm %s3014_s29, 320 }
 0x63d   : > { %p2173_p8 = scmp.ne.s32.totalorder %s2928_s19, %s2172_s24  ;;  %p2177_p11 = scmp.lt.s32.totalorder %s2928_s19, %s3014_s29 }
 0x63e   : > { %p2178_p12 = scmp.lt.s32.totalorder %s2176_s27, %s2172_s24 }
 0x63f   : > { %p2174_p9 = pnand %p2173_p8, %p2356_p5 }
 0x640   : > { %p2179_p13 = por %p2178_p12, %p2177_p11 }
 0x641   : > { %p2175_p10 = pneg %p2174_p9 }
 0x643   : > { %p2180_p0 = pnand %p2179_p13, %p2175_p10 }
 0x645   : > { %2183 = shalt.err (!%p2180_p0)
}
 0x646   : > { %s2232_s21 = smov 1  }
 0x647   : > { %2049 = dma.vmem_to_hbm [thread:$0]  (%p2356_p5), %s2930_s30, 64, %s2928_s19, %s1666_s17, %s2229_s14, %s2229_s14, %s2232_s21  }
 0x648 PF: > { %s3015_s26 = sld [smem:[#allocation10_spill]] }
 0x649   : > { %s3016_s18 = sld [smem:[#allocation8_spill]] }
 0x64e   : > { %p2060_p1 = scmp.ge.s32.totalorder %s3015_s26, 2 }
 0x64f   : > { %s1725_s20 = sand.u32 1, %s3016_s18  }
 0x650   : > { %p2054_p2 = pnand %p2060_p1, %p2360_p6  ;;  %s1726_s24 = scalar_lea.sflag [#allocation3], %s1725_s20 }
 0x652   : > { %p2055_p3 = pneg %p2054_p2 }
 0x654   : > { %2201 = dma.done.wait (%p2055_p3), %s1726_s24, 64  }
 0x655   : > { %2203 = vsyncadd (%p2055_p3), %s1726_s24, 4294967232  ;;  %s1743_s0 = scalar_lea.sflag [#allocation5], %s1725_s20 }
 0x656   : > { %2205 = dma.done.wait (%p2055_p3), %s1743_s0, 1024  }
 0x657   : > { %2207 = vsyncadd (%p2055_p3), %s1743_s0, 4294966272  ;;  %s3018_s24 = sld [smem:[#allocation11_spill]]  ;;  %s3021_s21 = smov %s2214_s22 }
 0x658   : > { %s3019_s23 = sld [smem:[#allocation9_spill]] }
 0x659   : > { %s3020_s27 = sld [smem:[#allocation12_spill]] }
 0x65d   : > { %p30_p5 = scmp.ge.s32.totalorder %s3018_s24, 7  }
 0x65e   : > { %s3022_s22 = smov %s3019_s23 }
 0x65f   : > { %s3023_s23 = smov %s3020_s27  ;;  %32 = sbr.rel (!%p30_p5) target bundleno = 9 (0x9), region = 143 }
 0x664   :  { %1748 = vsyncpa [#allocation3], 1 }
 0x665   :  { %1750 = vsyncpa [#allocation3 + $0x1], 1 }
 0x666   :  { %1751 = vsyncpa [#allocation5], 1 }
 0x667   :  { %1753 = vsyncpa [#allocation5 + $0x1], 1 }

// kernel: continual_mae_forward.5
= control target key start
LH: loop header
LB: loop body
LE: loop exit
PB: predicated region body
PF: predicated region fallthrough
CT: control target
= control target key end

     0   :  { %s2052_s0 = inlined_call_operand.vmem [shape: f32[4,4,768], index: 0, kind: input, shape index: {}]   ;;  %s2053_s1 = inlined_call_operand.vmem [shape: f32[4,4,1], index: 1, kind: input, shape index: {}]   ;;  %s2054_s2 = inlined_call_operand.vmem [shape: f32[768,32], index: 2, kind: input, shape index: {}]   ;;  %s2055_s3 = inlined_call_operand.vmem [shape: f32[1,32], index: 3, kind: input, shape index: {}]   ;;  %s2056_s4 = inlined_call_operand.vmem [shape: f32[1,32], index: 4, kind: input, shape index: {}]   ;;  %s2057_s5 = inlined_call_operand.vmem [shape: f32[1,32], index: 5, kind: input, shape index: {}]   ;;  %s2058_s6 = inlined_call_operand.vmem [shape: f32[32,32], index: 6, kind: input, shape index: {}]   ;;  %s2059_s7 = inlined_call_operand.vmem [shape: f32[1,32], index: 7, kind: input, shape index: {}]   ;;  %s2060_s8 = inlined_call_operand.vmem [shape: f32[1,32], index: 8, kind: input, shape index: {}]   ;;  %s2061_s9 = inlined_call_operand.vmem [shape: f32[1,32], index: 9, kind: input, shape index: {}]   ;;  %s2062_s10 = inlined_call_operand.vmem [shape: f32[32,128], index: 10, kind: input, shape index: {}]   ;;  %s2063_s11 = inlined_call_operand.vmem [shape: f32[1,128], index: 11, kind: input, shape index: {}]   ;;  %s2064_s12 = inlined_call_operand.vmem [shape: f32[32,512], index: 12, kind: input, shape index: {}]   ;;  %s2065_s13 = inlined_call_operand.vmem [shape: f32[1,512], index: 13, kind: input, shape index: {}]   ;;  %s2066_s14 = inlined_call_operand.vmem [shape: f32[4,1,128], index: 14, kind: output, shape index: {0}]   ;;  %s2067_s15 = inlined_call_operand.hbm [shape: f32[4,4,32], index: 15, kind: output, shape index: {1}]   ;;  %s2068_s16 = inlined_call_operand.vmem [shape: f32[4,4,512], index: 16, kind: output, shape index: {2}]  }
   0x1   :  { %2070 = sst [smem:[#allocation5_spill]] %s2052_s0 }
   0x2   :  { %v94_v0 = vld [vmem:[%s2054_s2 + $0xf8] sm:$0xff]  ;;  %v93_v2 = vld [vmem:[%s2054_s2 + $0xf0] sm:$0xff]  ;;  %v1411_v6 = vmov 0   ;;  %v92_v7 = vld [vmem:[%s2054_s2 + $0xe8] sm:$0xff]  ;;  %s2071_s21 = sld [smem:[#allocation5_spill]] }
   0x3   :  { %v78_v1 = vld [vmem:[%s2054_s2 + $0x78] sm:$0xff]  ;;  %1187 = vmatprep.subr.mxu0 %v94_v0  ;;  %v77_v4 = vld [vmem:[%s2054_s2 + $0x70] sm:$0xff]  ;;  %1358 = vset.pattern.permute.xlu1 %v1411_v6  ;;  %v76_v9 = vld [vmem:[%s2054_s2 + $0x68] sm:$0xff] }
   0x4   :  { %v126_v3 = vld [vmem:[%s2054_s2 + $0x1f8] sm:$0xff]  ;;  %1188 = vmatpush3.msra.mxu0 %v78_v1  ;;  %v125_v8 = vld [vmem:[%s2054_s2 + $0x1f0] sm:$0xff]  ;;  %v124_v11 = vld [vmem:[%s2054_s2 + $0x1e8] sm:$0xff]  ;;  %1357 = vset.pattern.permute.xlu0 %v1411_v6 }
   0x5   :  { %v110_v5 = vld [vmem:[%s2054_s2 + $0x178] sm:$0xff]  ;;  %1225 = vmatprep.subr.mxu1 %v126_v3  ;;  %1189 = vmatprep.subr.mxu0 %v93_v2  ;;  %v109_v10 = vld [vmem:[%s2054_s2 + $0x170] sm:$0xff]  ;;  %v91_v12 = vld [vmem:[%s2054_s2 + $0xe0] sm:$0xff] }
   0x6   :  { %1226 = vmatpush3.msra.mxu1 %v110_v5  ;;  %1190 = vmatpush3.msra.mxu0 %v77_v4  ;;  %v108_v13 = vld [vmem:[%s2054_s2 + $0x168] sm:$0xff]  ;;  %v75_v14 = vld [vmem:[%s2054_s2 + $0x60] sm:$0xff]  ;;  %v90_v16 = vld [vmem:[%s2054_s2 + $0xd8] sm:$0xff] }
   0x7   :  { %1227 = vmatprep.subr.mxu1 %v125_v8  ;;  %1191 = vmatprep.subr.mxu0 %v92_v7  ;;  %v123_v15 = vld [vmem:[%s2054_s2 + $0x1e0] sm:$0xff]  ;;  %v74_v18 = vld [vmem:[%s2054_s2 + $0x58] sm:$0xff]  ;;  %v89_v20 = vld [vmem:[%s2054_s2 + $0xd0] sm:$0xff] }
   0x8   :  { %1228 = vmatpush3.msra.mxu1 %v109_v10  ;;  %1192 = vmatpush3.msra.mxu0 %v76_v9  ;;  %v107_v17 = vld [vmem:[%s2054_s2 + $0x160] sm:$0xff]  ;;  %v122_v19 = vld [vmem:[%s2054_s2 + $0x1d8] sm:$0xff]  ;;  %v73_v22 = vld [vmem:[%s2054_s2 + $0x50] sm:$0xff] }
   0x9   :  { %1229 = vmatprep.subr.mxu1 %v124_v11  ;;  %1193 = vmatprep.subr.mxu0 %v91_v12  ;;  %v106_v21 = vld [vmem:[%s2054_s2 + $0x158] sm:$0xff]  ;;  %v121_v23 = vld [vmem:[%s2054_s2 + $0x1d0] sm:$0xff]  ;;  %v88_v24 = vld [vmem:[%s2054_s2 + $0xc8] sm:$0xff] }
   0xa   :  { %1230 = vmatpush3.msra.mxu1 %v108_v13  ;;  %1194 = vmatpush3.msra.mxu0 %v75_v14  ;;  %v105_v25 = vld [vmem:[%s2054_s2 + $0x150] sm:$0xff]  ;;  %v72_v26 = vld [vmem:[%s2054_s2 + $0x48] sm:$0xff]  ;;  %v87_v28 = vld [vmem:[%s2054_s2 + $0xc0] sm:$0xff] }
   0xb   :  { %1231 = vmatprep.subr.mxu1 %v123_v15  ;;  %1195 = vmatprep.subr.mxu0 %v90_v16  ;;  %v120_v27 = vld [vmem:[%s2054_s2 + $0x1c8] sm:$0xff]  ;;  %v71_v30 = vld [vmem:[%s2054_s2 + $0x40] sm:$0xff]  ;;  %v86_v32 = vld [vmem:[%s2054_s2 + $0xb8] sm:$0xff] }
   0xc   :  { %1232 = vmatpush3.msra.mxu1 %v107_v17  ;;  %1196 = vmatpush3.msra.mxu0 %v74_v18  ;;  %v104_v29 = vld [vmem:[%s2054_s2 + $0x148] sm:$0xff]  ;;  %v119_v31 = vld [vmem:[%s2054_s2 + $0x1c0] sm:$0xff]  ;;  %v70_v34 = vld [vmem:[%s2054_s2 + $0x38] sm:$0xff] }
   0xd   :  { %1233 = vmatprep.subr.mxu1 %v122_v19  ;;  %1197 = vmatprep.subr.mxu0 %v89_v20  ;;  %v103_v33 = vld [vmem:[%s2054_s2 + $0x140] sm:$0xff]  ;;  %v118_v35 = vld [vmem:[%s2054_s2 + $0x1b8] sm:$0xff]  ;;  %v85_v36 = vld [vmem:[%s2054_s2 + $0xb0] sm:$0xff] }
   0xe   :  { %1234 = vmatpush3.msra.mxu1 %v106_v21  ;;  %1198 = vmatpush3.msra.mxu0 %v73_v22  ;;  %v102_v37 = vld [vmem:[%s2054_s2 + $0x138] sm:$0xff]  ;;  %v69_v38 = vld [vmem:[%s2054_s2 + $0x30] sm:$0xff]  ;;  %v84_v40 = vld [vmem:[%s2054_s2 + $0xa8] sm:$0xff] }
   0xf   :  { %1235 = vmatprep.subr.mxu1 %v121_v23  ;;  %1199 = vmatprep.subr.mxu0 %v88_v24  ;;  %v117_v39 = vld [vmem:[%s2054_s2 + $0x1b0] sm:$0xff]  ;;  %v68_v42 = vld [vmem:[%s2054_s2 + $0x28] sm:$0xff]  ;;  %v83_v43 = vld [vmem:[%s2054_s2 + $0xa0] sm:$0xff] }
  0x10   :  { %1236 = vmatpush3.msra.mxu1 %v105_v25  ;;  %1200 = vmatpush3.msra.mxu0 %v72_v26  ;;  %v101_v41 = vld [vmem:[%s2054_s2 + $0x130] sm:$0xff]  ;;  %v116_v44 = vld [vmem:[%s2054_s2 + $0x1a8] sm:$0xff]  ;;  %v67_v46 = vld [vmem:[%s2054_s2 + $0x20] sm:$0xff] }
  0x11   :  { %1237 = vmatprep.subr.mxu1 %v120_v27  ;;  %1201 = vmatprep.subr.mxu0 %v87_v28  ;;  %v100_v45 = vld [vmem:[%s2054_s2 + $0x128] sm:$0xff]  ;;  %v115_v47 = vld [vmem:[%s2054_s2 + $0x1a0] sm:$0xff]  ;;  %v82_v48 = vld [vmem:[%s2054_s2 + $0x98] sm:$0xff] }
  0x12   :  { %1238 = vmatpush3.msra.mxu1 %v104_v29  ;;  %1202 = vmatpush3.msra.mxu0 %v71_v30  ;;  %v66_v49 = vld [vmem:[%s2054_s2 + $0x18] sm:$0xff]  ;;  %v99_v50 = vld [vmem:[%s2054_s2 + $0x120] sm:$0xff]  ;;  %v81_v52 = vld [vmem:[%s2054_s2 + $0x90] sm:$0xff] }
  0x13   :  { %1239 = vmatprep.subr.mxu1 %v119_v31  ;;  %1203 = vmatprep.subr.mxu0 %v86_v32  ;;  %v114_v51 = vld [vmem:[%s2054_s2 + $0x198] sm:$0xff]  ;;  %v65_v54 = vld [vmem:[%s2054_s2 + $0x10] sm:$0xff]  ;;  %v80_v56 = vld [vmem:[%s2054_s2 + $0x88] sm:$0xff] }
  0x14   :  { %1240 = vmatpush3.msra.mxu1 %v103_v33  ;;  %1204 = vmatpush3.msra.mxu0 %v70_v34  ;;  %v98_v53 = vld [vmem:[%s2054_s2 + $0x118] sm:$0xff]  ;;  %v113_v55 = vld [vmem:[%s2054_s2 + $0x190] sm:$0xff]  ;;  %v64_v58 = vld [vmem:[%s2054_s2 + $0x8] sm:$0xff] }
  0x15   :  { %1241 = vmatprep.subr.mxu1 %v118_v35  ;;  %1205 = vmatprep.subr.mxu0 %v85_v36  ;;  %v97_v57 = vld [vmem:[%s2054_s2 + $0x110] sm:$0xff]  ;;  %v112_v59 = vld [vmem:[%s2054_s2 + $0x188] sm:$0xff]  ;;  %v1361_v60 = vld [vmem:[%s2071_s21 + $0x4] ss:$24 sps:$4 sm:$0xff]  }
  0x16   :  { %1242 = vmatpush3.msra.mxu1 %v102_v37  ;;  %1206 = vmatpush3.msra.mxu0 %v69_v38  ;;  %v79_v61 = vld [vmem:[%s2054_s2 + $0x80] sm:$0xff]  ;;  %v96_v0 = vld [vmem:[%s2054_s2 + $0x108] sm:$0xff]  ;;  %v158_v2 = vld [vmem:[%s2054_s2 + $0x2f8] sm:$0xff] }
  0x17   :  { %1243 = vmatprep.subr.mxu1 %v117_v39  ;;  %1207 = vmatprep.subr.mxu0 %v84_v40  ;;  %v63_v62 = vld [vmem:[%s2054_s2] sm:$0xff]  ;;  %v142_v7 = vld [vmem:[%s2054_s2 + $0x278] sm:$0xff]  ;;  %v157_v8 = vld [vmem:[%s2054_s2 + $0x2f0] sm:$0xff] }
  0x18   :  { %1244 = vmatpush3.msra.mxu1 %v101_v41  ;;  %1208 = vmatpush3.msra.mxu0 %v68_v42  ;;  %v1359_v63 = vld [vmem:[%s2071_s21] ss:$24 sps:$4 sm:$0xff]   ;;  %v1364_v5 = vld [vmem:[%s2071_s21 + $0xc] ss:$24 sps:$4 sm:$0xff]   ;;  %v141_v9 = vld [vmem:[%s2054_s2 + $0x270] sm:$0xff] }
  0x19   :  { %1245 = vmatprep.subr.mxu1 %v116_v44  ;;  %1209 = vmatprep.subr.mxu0 %v83_v43  ;;  %v111_v1 = vld [vmem:[%s2054_s2 + $0x180] sm:$0xff]  ;;  %v1365_v10 = vld [vmem:[%s2071_s21 + $0x34] ss:$24 sps:$4 sm:$0xff]   ;;  %v1367_v11 = vld [vmem:[%s2071_s21 + $0x30] ss:$24 sps:$4 sm:$0xff]  }
  0x1a   :  { %1246 = vmatpush3.msra.mxu1 %v100_v45  ;;  %1210 = vmatpush3.msra.mxu0 %v67_v46  ;;  %v95_v3 = vld [vmem:[%s2054_s2 + $0x100] sm:$0xff]  ;;  %v156_v12 = vld [vmem:[%s2054_s2 + $0x2e8] sm:$0xff]  ;;  %v1368_v13 = vld [vmem:[%s2071_s21 + $0x3c] ss:$24 sps:$4 sm:$0xff]  }
  0x1b   :  { %1247 = vmatprep.subr.mxu1 %v115_v47  ;;  %1211 = vmatprep.subr.mxu0 %v82_v48  ;;  %v1362_v4 = vld [vmem:[%s2071_s21 + $0x8] ss:$24 sps:$4 sm:$0xff]   ;;  %v1370_v15 = vld [vmem:[%s2071_s21 + $0x38] ss:$24 sps:$4 sm:$0xff]   ;;  %v1373_v18 = vld [vmem:[%s2071_s21 + $0x14] ss:$24 sps:$4 sm:$0xff]  }
  0x1c   :  { %1248 = vmatpush3.msra.mxu1 %v99_v50  ;;  %1212 = vmatpush3.msra.mxu0 %v66_v49  ;;  %v140_v14 = vld [vmem:[%s2054_s2 + $0x268] sm:$0xff]  ;;  %v155_v16 = vld [vmem:[%s2054_s2 + $0x2e0] sm:$0xff]  ;;  %v154_v19 = vld [vmem:[%s2054_s2 + $0x2d8] sm:$0xff] }
  0x1d   :  { %1249 = vmatprep.subr.mxu1 %v114_v51  ;;  %1213 = vmatprep.subr.mxu0 %v81_v52  ;;  %v139_v17 = vld [vmem:[%s2054_s2 + $0x260] sm:$0xff]  ;;  %v138_v20 = vld [vmem:[%s2054_s2 + $0x258] sm:$0xff]  ;;  %v153_v22 = vld [vmem:[%s2054_s2 + $0x2d0] sm:$0xff] }
  0x1e   :  { %1250 = vmatpush3.msra.mxu1 %v98_v53  ;;  %1214 = vmatpush3.msra.mxu0 %v65_v54  ;;  %v433_v21 = vld [vmem:[%s2053_s1] sm:$0xf]  ;;  %v434_v24 = vld [vmem:[%s2053_s1 + $0x4] sm:$0xf]  ;;  %v137_v25 = vld [vmem:[%s2054_s2 + $0x250] sm:$0xff] }
  0x1f   :  { %1251 = vmatprep.subr.mxu1 %v113_v55  ;;  %1215 = vmatprep.subr.mxu0 %v80_v56  ;;  %v468_v23 = vsub.f32 1.0, %v433_v21 }
  0x20   :  { %1252 = vmatpush3.msra.mxu1 %v97_v57  ;;  %1216 = vmatpush3.msra.mxu0 %v64_v58 }
  0x21   :  { %1253 = vmatprep.subr.mxu1 %v112_v59  ;;  %1217 = vmatprep.subr.mxu0 %v79_v61 }
  0x22   :  { %266 = vmatprep.mubr.f32.mxu0 %v1361_v60  ;;  %1218 = vmatpush3.msra.mxu0 %v63_v62 }
  0x23   :  { %1254 = vmatpush3.msra.mxu1 %v96_v0  ;;  %267 = vmatmul.mubr.f32.vlgmr.msra.gmra.mxu0 %v1359_v63 }
  0x24   :  { %1255 = vmatprep.subr.mxu1 %v111_v1  ;;  %1263 = vmatprep.subr.mxu0 %v158_v2 }
  0x25   :  { %1256 = vmatpush3.msra.mxu1 %v95_v3  ;;  %341 = vmatprep.mubr.f32.mxu1 %v1364_v5 }
  0x26   :  { %1264 = vmatpush3.msra.mxu0 %v142_v7  ;;  %342 = vmatmul.mubr.f32.vlgmr.msra.gmra.mxu1 %v1362_v4 }
  0x27   :  { %1265 = vmatprep.subr.mxu0 %v157_v8  ;;  %271 = vmatprep.mubr.f32.mxu0 %v1365_v10 }
  0x28   :  { %1266 = vmatpush3.msra.mxu0 %v141_v9  ;;  %346 = vmatprep.mubr.f32.mxu1 %v1368_v13 }
  0x29   :  { %1267 = vmatprep.subr.mxu0 %v156_v12  ;;  %272 = vmatmul.mubr.f32.gmra.mxu0 %v1367_v11 }
  0x2a   :  { %1268 = vmatpush3.msra.mxu0 %v140_v14  ;;  %347 = vmatmul.mubr.f32.gmra.mxu1 %v1370_v15 }
  0x2b   :  { %1269 = vmatprep.subr.mxu0 %v155_v16  ;;  %416 = vmatprep.mubr.f32.mxu0 %v1373_v18 }
  0x2c   :  { %1270 = vmatpush3.msra.mxu0 %v139_v17 }
  0x2d   :  { %1271 = vmatprep.subr.mxu0 %v154_v19 }
  0x2e   :  { %22 = vsyncpa [#allocation3], 0  ;;  %1272 = vmatpush3.msra.mxu0 %v138_v20  ;;  %v152_v26 = vld [vmem:[%s2054_s2 + $0x2c8] sm:$0xff]  ;;  %440 = vperm.xlu0 %1357, %v433_v21   ;;  %v469_v28 = vsub.f32 1.0, %v434_v24  ;;  %v151_v29 = vld [vmem:[%s2054_s2 + $0x2c0] sm:$0xff]  ;;  %vm517_vm0 = vcmask 261120  }
  0x2f   :  { %1273 = vmatprep.subr.mxu0 %v153_v22  ;;  %v136_v27 = vld [vmem:[%s2054_s2 + $0x248] sm:$0xff]  ;;  %474 = vperm.xlu1 %1358, %v468_v23   ;;  %v135_v6 = vld [vmem:[%s2054_s2 + $0x240] sm:$0xff]  ;;  %v150_v30 = vld [vmem:[%s2054_s2 + $0x2b8] sm:$0xff]  ;;  %vm1413_vm1 = vmmov 0   ;;  %vm666_vm2 = vcmask 257024  }
  0x30   :  { %1274 = vmatpush3.msra.mxu0 %v137_v25  ;;  %v134_v31 = vld [vmem:[%s2054_s2 + $0x238] sm:$0xff]  ;;  %v435_v32 = vld [vmem:[%s2053_s1 + $0x8] sm:$0xf]  ;;  %v149_v33 = vld [vmem:[%s2054_s2 + $0x2b0] sm:$0xff] }
  0x31   :  { %1275 = vmatprep.subr.mxu0 %v152_v26  ;;  %v436_v34 = vld [vmem:[%s2053_s1 + $0xc] sm:$0xf]  ;;  %v133_v35 = vld [vmem:[%s2054_s2 + $0x230] sm:$0xff]  ;;  %v470_v37 = vsub.f32 1.0, %v435_v32  ;;  %v147_v40 = vld [vmem:[%s2054_s2 + $0x2a0] sm:$0xff]  ;;  %s1414_s1 = smov [#allocation2]  }
  0x32   :  { %1276 = vmatpush3.msra.mxu0 %v136_v27  ;;  %445 = vperm.xlu0 %1357, %v434_v24   ;;  %v148_v36 = vld [vmem:[%s2054_s2 + $0x2a8] sm:$0xff]  ;;  %v471_v39 = vsub.f32 1.0, %v436_v34  ;;  %v131_v41 = vld [vmem:[%s2054_s2 + $0x220] sm:$0xff]  ;;  %v146_v42 = vld [vmem:[%s2054_s2 + $0x298] sm:$0xff]  ;;  %s1150_s30 = sshll.u32 %s1414_s1, 4  ;;  %s1151_s30 = int_to_ptr.vmem [resolvable:$true] %s1150_s30 }
  0x33   :  { %1277 = vmatprep.subr.mxu0 %v151_v29  ;;  %479 = vperm.xlu1 %1358, %v469_v28   ;;  %v132_v38 = vld [vmem:[%s2054_s2 + $0x228] sm:$0xff]  ;;  %v130_v43 = vld [vmem:[%s2054_s2 + $0x218] sm:$0xff]  ;;  %v145_v44 = vld [vmem:[%s2054_s2 + $0x290] sm:$0xff]  ;;  %p1394_p1 = scmp.lt.s32.totalorder %s1151_s30, %s1151_s30 }
  0x34   :  { %1278 = vmatpush3.msra.mxu0 %v135_v6  ;;  %v129_v45 = vld [vmem:[%s2054_s2 + $0x210] sm:$0xff]  ;;  %v144_v46 = vld [vmem:[%s2054_s2 + $0x288] sm:$0xff]  ;;  %v143_v48 = vld [vmem:[%s2054_s2 + $0x280] sm:$0xff] }
  0x35   :  { %1279 = vmatprep.subr.mxu0 %v150_v30  ;;  %v128_v47 = vld [vmem:[%s2054_s2 + $0x208] sm:$0xff]  ;;  %v127_v49 = vld [vmem:[%s2054_s2 + $0x200] sm:$0xff]  ;;  %v1844_v53 = vld [vmem:[%s2058_s6 + $0x18] sm:$0xff] }
  0x36   :  { %1280 = vmatpush3.msra.mxu0 %v134_v31  ;;  %450 = vperm.xlu0 %1357, %v435_v32   ;;  %v1371_v50 = vld [vmem:[%s2071_s21 + $0x10] ss:$24 sps:$4 sm:$0xff]   ;;  %v1374_v51 = vld [vmem:[%s2071_s21 + $0x44] ss:$24 sps:$4 sm:$0xff]   ;;  %v1376_v52 = vld [vmem:[%s2071_s21 + $0x40] ss:$24 sps:$4 sm:$0xff]  }
  0x37   :  { %1281 = vmatprep.subr.mxu0 %v149_v33  ;;  %455 = vperm.xlu1 %1358, %v436_v34   ;;  %v1851_v54 = vld [vmem:[%s2058_s6 + $0x10] sm:$0xff]  ;;  %v1858_v55 = vld [vmem:[%s2058_s6 + $0x8] sm:$0xff]  ;;  %v1865_v56 = vld [vmem:[%s2058_s6] sm:$0xff] }
  0x38   :  { %1282 = vmatpush3.msra.mxu0 %v133_v35  ;;  %1317 = vmatprep.subr.mxu1 %v1844_v53  ;;  %v1167_v1 = vld [vmem:[%s2055_s3] ss:$0 sm:$0xff] }
  0x39   :  { %1283 = vmatprep.subr.mxu0 %v148_v36  ;;  %1318 = vmatpush3.msra.mxu1 %v1844_v53  ;;  %v1168_v20 = vld [vmem:[%s2056_s4] ss:$0 sm:$0xff] }
  0x3a   :  { %1284 = vmatpush3.msra.mxu0 %v132_v38  ;;  %484 = vperm.xlu0 %1357, %v470_v37  }
  0x3b   :  { %1285 = vmatprep.subr.mxu0 %v147_v40  ;;  %489 = vperm.xlu1 %1358, %v471_v39  }
  0x3c   :  { %1286 = vmatpush3.msra.mxu0 %v131_v41  ;;  %1319 = vmatprep.subr.mxu1 %v1851_v54 }
  0x3d   :  { %1287 = vmatprep.subr.mxu0 %v146_v42  ;;  %1320 = vmatpush3.msra.mxu1 %v1851_v54 }
  0x3e   :  { %1288 = vmatpush3.msra.mxu0 %v130_v43  ;;  %1321 = vmatprep.subr.mxu1 %v1858_v55  ;;  %v1880_v43 = vld [vmem:[%s2059_s7] ss:$0 sm:$0xff] }
  0x3f   :  { %1289 = vmatprep.subr.mxu0 %v145_v44  ;;  %1322 = vmatpush3.msra.mxu1 %v1858_v55 }
  0x40   :  { %1290 = vmatpush3.msra.mxu0 %v129_v45  ;;  %1323 = vmatprep.subr.mxu1 %v1865_v56 }
  0x41   :  { %1291 = vmatprep.subr.mxu0 %v144_v46  ;;  %1324 = vmatpush3.msra.mxu1 %v1865_v56 }
  0x42   :  { %1292 = vmatpush3.msra.mxu0 %v128_v47 }
  0x43   :  { %1293 = vmatprep.subr.mxu0 %v143_v48 }
  0x44   :  { %1294 = vmatpush3.msra.mxu0 %v127_v49 }
  0x45   :  { %417 = vmatmul.mubr.f32.vlgmr.msra.gmra.mxu0 %v1371_v50 }
  0x46   :  { %421 = vmatprep.mubr.f32.mxu0 %v1374_v51 }
  0x49   :  { %422 = vmatmul.mubr.f32.gmra.mxu0 %v1376_v52 }
  0xa9   :  { %v441_v60 = vpop.permute.xlu0 %440 }
  0xaa   :  { %v475_v62 = vpop.permute.xlu1 %474  ;;  %v464_v27 = vmul.f32 %v1168_v20, %v441_v60 }
  0xad   :  { %v446_v4 = vpop.permute.xlu0 %445 }
  0xae   :  { %v480_v8 = vpop.permute.xlu1 %479  ;;  %v465_v28 = vmul.f32 %v1168_v20, %v446_v4 }
  0xb1   :  { %v451_v17 = vpop.permute.xlu0 %450 }
  0xb2   :  { %v456_v21 = vpop.permute.xlu1 %455  ;;  %v466_v36 = vmul.f32 %v1168_v20, %v451_v17 }
  0xb3   :  { %v467_v37 = vmul.f32 %v1168_v20, %v456_v21  ;;  %v683_v20 = vld [vmem:[%s2064_s12 + $0x60] sm:$0xff]  ;;  %v680_v21 = vld [vmem:[%s2064_s12 + $0x48] sm:$0xff] }
  0xb5   :  { %v485_v30 = vpop.permute.xlu0 %484 }
  0xb6   :  { %v490_v35 = vpop.permute.xlu1 %489 }
  0xe3   :  { %v1219_v57 = vpop.f32.mrf.mxu0 }
  0xe5   :  { %v1220_v58 = vpop.f32.mrf.mxu0 }
  0xe6   :  { %v1257_v59 = vpop.f32.mrf.mxu1  ;;  %v1221_v0 = vadd.f32 %v1220_v58, %v1219_v57 }
  0xe8   :  { %v1258_v63 = vpop.f32.mrf.mxu1  ;;  %v269_v5 = vadd.f32 %v1221_v0, %v1167_v1 }
  0xe9   :  { %v1222_v61 = vpop.f32.mrf.mxu0  ;;  %v1259_v7 = vadd.f32 %v1258_v63, %v1257_v59 }
  0xea   :  { %v1260_v3 = vpop.f32.mrf.mxu1 }
  0xeb   :  { %v1223_v2 = vpop.f32.mrf.mxu0  ;;  %v344_v13 = vadd.f32 %v1259_v7, %v269_v5 }
  0xec   :  { %v1224_v9 = vadd.f32 %v1223_v2, %v1222_v61  ;;  %v1261_v10 = vpop.f32.mrf.mxu1 }
  0xed   :  { %v1262_v15 = vadd.f32 %v1261_v10, %v1260_v3 }
  0xee   :  { %v274_v14 = vadd.f32 %v1224_v9, %v1167_v1 }
  0xf0   :  { %v349_v23 = vadd.f32 %v1262_v15, %v274_v14 }
 0x105   :  { %v1295_v11 = vpop.f32.mrf.mxu0 }
 0x107   :  { %v1296_v12 = vpop.f32.mrf.mxu0 }
 0x108   :  { %v1297_v16 = vadd.f32 %v1296_v12, %v1295_v11 }
 0x109   :  { %v1298_v18 = vpop.f32.mrf.mxu0 }
 0x10a   :  { %v419_v19 = vadd.f32 %v1297_v16, %v344_v13 }
 0x10b   :  { %v1299_v22 = vpop.f32.mrf.mxu0 }
 0x10c   :  { %v429_v24 = vcombine.high %v419_v19, %v419_v19  ;;  %v492_v25 = vmul.f32 %v475_v62, %v419_v19  ;;  %v1300_v26 = vadd.f32 %v1299_v22, %v1298_v18  ;;  %v684_v19 = vld [vmem:[%s2064_s12 + $0x68] sm:$0xff]  ;;  %v679_v22 = vld [vmem:[%s2064_s12 + $0x40] sm:$0xff] }
 0x10d   :  { %737 = vmatprep.subr.mxu1 %v684_v19 }
 0x10e   :  { %v493_v29 = vmul.f32 %v480_v8, %v429_v24  ;;  %v424_v6 = vadd.f32 %v1300_v26, %v349_v23  ;;  %v496_v31 = vadd.f32 %v492_v25, %v464_v27  ;;  %v676_v23 = vld [vmem:[%s2064_s12 + $0x28] sm:$0xff]  ;;  %v675_v24 = vld [vmem:[%s2064_s12 + $0x20] sm:$0xff]  ;;  %v1412_v26 = vmov 0.0  }
 0x10f   :  { %v672_v25 = vld [vmem:[%s2064_s12 + $0x8] sm:$0xff]  ;;  %v671_v27 = vld [vmem:[%s2064_s12] sm:$0xff]  ;;  %1339 = vmatprep.subr.mxu0 %v1412_v26  ;;  %1347 = vmatprep.mubr.msk.f32.mxu0 %vm1413_vm1, %v1412_v26 }
 0x110   :  { %v497_v32 = vadd.f32 %v493_v29, %v465_v28  ;;  %v430_v33 = vcombine.high %v424_v6, %v424_v6  ;;  %v494_v34 = vmul.f32 %v485_v30, %v424_v6  ;;  %v686_v28 = vld [vmem:[%s2064_s12 + $0x78] sm:$0xff] }
 0x112   :  { %v495_v38 = vmul.f32 %v490_v35, %v430_v33  ;;  %v515_v39 = vcombine.low %v496_v31, %v497_v32  ;;  %v498_v40 = vadd.f32 %v494_v34, %v466_v36  ;;  %v1922_v35 = vld [vmem:[%s2060_s8] ss:$0 sm:$0xff] }
 0x114   :  { %v499_v41 = vadd.f32 %v495_v38, %v467_v37  ;;  %1325 = vmatprep.mubr.msk.f32.mxu1 %vm517_vm0, %v515_v39  ;;  %v1927_v37 = vld [vmem:[%s2061_s9] ss:$0 sm:$0xff] }
 0x116   :  { %v516_v42 = vcombine.low %v498_v40, %v499_v41  ;;  %v685_v41 = vld [vmem:[%s2064_s12 + $0x70] sm:$0xff] }
 0x118   :  { %1326 = vmatmul.mubr.msk.f32.vlgmr.msra.gmra.mxu1 %vm517_vm0, %v516_v42 }
 0x119   :  { %738 = vmatpush1.msra.mxu1 %v683_v20  ;;  %777 = vmatprep.mubr.f32.mxu1 %v1412_v26 }
 0x11a   :  { %739 = vmatprep.subr.mxu1 %v680_v21 }
 0x11b   :  { %740 = vmatpush1.msra.mxu1 %v679_v22 }
 0x11c   :  { %741 = vmatprep.subr.mxu1 %v676_v23 }
 0x11d   :  { %742 = vmatpush1.msra.mxu1 %v675_v24 }
 0x11e   :  { %743 = vmatprep.subr.mxu1 %v672_v25 }
 0x11f   :  { %744 = vmatpush1.msra.mxu1 %v671_v27 }
 0x120   :  { %814 = vmatprep.subr.mxu1 %v686_v28 }
 0x1d8   :  { %v1327_v44 = vpop.f32.mrf.mxu1 }
 0x1d9   :  { %v594_v45 = vadd.f32 %v1327_v44, %v1880_v43  ;;  %v682_v44 = vld [vmem:[%s2064_s12 + $0x58] sm:$0xff] }
 0x1da   :  { %v588_v46 = vpop.f32.mrf.mxu1 }
 0x1db   :  { %v598_v47 = vmul.f32 %v594_v45, %v594_v45  ;;  %v589_v48 = vadd.f32 %v1880_v43, %v588_v46 }
 0x1dd   :  { %v600_v49 = vmul.f32 %v598_v47, %v594_v45  ;;  %v597_v50 = vmul.f32 %v589_v48, %v589_v48 }
 0x1df   :  { %v602_v51 = vmul.f32 0.044715, %v600_v49  ;;  %v599_v52 = vmul.f32 %v597_v50, %v589_v48  ;;  %v677_v50 = vld [vmem:[%s2064_s12 + $0x30] sm:$0xff] }
 0x1e1   :  { %v604_v57 = vadd.f32 %v602_v51, %v594_v45  ;;  %v601_v58 = vmul.f32 0.044715, %v599_v52  ;;  %v674_v51 = vld [vmem:[%s2064_s12 + $0x18] sm:$0xff] }
 0x1e3   :  { %v603_v59 = vadd.f32 %v601_v58, %v589_v48  ;;  %v606_v60 = vmul.f32 0.7978846, %v604_v57  ;;  %v673_v57 = vld [vmem:[%s2064_s12 + $0x10] sm:$0xff]  ;;  %v1178_v58 = vld [vmem:[%s2057_s5] ss:$0 sm:$0xff] }
 0x1e5   :  { %1377 = vtanh.f32 %v606_v60  ;;  %v605_v61 = vmul.f32 0.7978846, %v603_v59  ;;  %v687_v60 = vld [vmem:[%s2065_s13] sm:$0xf] }
 0x1e7   :  { %1379 = vtanh.f32 %v605_v61 }
 0x1f2   :  { %v1378_v62 = vpop.eup %1377 }
 0x1f3   :  { %v610_v63 = vadd.f32 1.0, %v1378_v62 }
 0x1f4   :  { %v1380_v0 = vpop.eup %1379 }
 0x1f5   :  { %v612_v1 = vmul.f32 0.5, %v610_v63  ;;  %v609_v2 = vadd.f32 1.0, %v1380_v0 }
 0x1f7   :  { %v614_v3 = vmul.f32 %v612_v1, %v594_v45  ;;  %v611_v4 = vmul.f32 0.5, %v609_v2  ;;  %v681_v45 = vld [vmem:[%s2064_s12 + $0x50] sm:$0xff] }
 0x1f9   :  { %v618_v5 = vsel %vm517_vm0, %v614_v3, 0.0  ;;  %v613_v7 = vmul.f32 %v611_v4, %v589_v48  ;;  %v678_v48 = vld [vmem:[%s2064_s12 + $0x38] sm:$0xff] }
 0x1fa   :  { %619 = vadd.xlane.f32.xlu1 %v618_v5 }
 0x1fb   :  { %v615_v8 = vsel %vm517_vm0, %v613_v7, 0.0 }
 0x1fc   :  { %616 = vadd.xlane.f32.xlu0 %v615_v8 }
 0x283   :  { %v620_v9 = vpop.xlane.xlu1 %619 }
 0x284   :  { %v623_v10 = vmul.f32 0.03125, %v620_v9 }
 0x285   :  { %v617_v11 = vpop.xlane.xlu0 %616 }
 0x286   :  { %v622_v12 = vmul.f32 0.03125, %v617_v11  ;;  %v625_v13 = vsub.f32 %v614_v3, %v623_v10 }
 0x288   :  { %v624_v14 = vsub.f32 %v613_v7, %v622_v12  ;;  %v627_v17 = vmul.f32 %v625_v13, %v625_v13 }
 0x28a   :  { %v626_v15 = vmul.f32 %v624_v14, %v624_v14  ;;  %v631_v18 = vsel %vm517_vm0, %v627_v17, 0.0 }
 0x28c   :  { %v628_v16 = vsel %vm517_vm0, %v626_v15, 0.0 }
 0x28d   :  { %629 = vadd.xlane.f32.xlu0 %v628_v16 }
 0x291   :  { %632 = vadd.xlane.f32.xlu0 %v631_v18 }
 0x316   :  { %v630_v29 = vpop.xlane.xlu0 %629 }
 0x317   :  { %v634_v6 = vmul.f32 0.03125, %v630_v29 }
 0x319   :  { %v636_v30 = vadd.f32 1e-05, %v634_v6 }
 0x31a   :  { %v633_v31 = vpop.xlane.xlu0 %632 }
 0x31b   :  { %1381 = vrsqrt.f32 %v636_v30  ;;  %v635_v32 = vmul.f32 0.03125, %v633_v31 }
 0x31d   :  { %v637_v33 = vadd.f32 1e-05, %v635_v32 }
 0x31f   :  { %1383 = vrsqrt.f32 %v637_v33 }
 0x328   :  { %v1382_v34 = vpop.eup %1381 }
 0x329   :  { %v640_v36 = vmul.f32 %v1382_v34, %v624_v14 }
 0x32b   :  { %v649_v38 = vmul.f32 %v1922_v35, %v640_v36 }
 0x32c   :  { %v1384_v39 = vpop.eup %1383 }
 0x32d   :  { %v658_v40 = vadd.f32 %v1927_v37, %v649_v38  ;;  %v641_v42 = vmul.f32 %v1384_v39, %v625_v13 }
 0x32f   :  { %1174 = vmatmul.mubr.msk.f32.vlgmr.msra.gmra.mxu1 %vm517_vm0, %v658_v40  ;;  %v650_v46 = vmul.f32 %v1922_v35, %v641_v42  ;;  %667 = vst.msk [vmem:[#allocation2] sm:$0xf] %vm666_vm2, %v658_v40  ;;  %v662_v47 = vcombine.high %v658_v40, %v658_v40 }
 0x330   :  { %815 = vmatpush1.msra.mxu1 %v685_v41  ;;  %783 = vmatprep.mubr.f32.mxu1 %v1412_v26 }
 0x331   :  { %816 = vmatprep.subr.mxu1 %v682_v44  ;;  %v659_v49 = vadd.f32 %v1927_v37, %v650_v46  ;;  %668 = vst.msk [vmem:[#allocation2 + $0x4] sm:$0xf] %vm666_vm2, %v662_v47  ;;  %v1029_v47 = vld [vmem:[%s2062_s10 + $0x18] sm:$0xff] }
 0x332   :  { %817 = vmatpush1.msra.mxu1 %v681_v45  ;;  %1340 = vmatpush3.msra.mxu0 %v1029_v47 }
 0x333   :  { %818 = vmatprep.subr.mxu1 %v678_v48  ;;  %v663_v52 = vcombine.high %v659_v49, %v659_v49  ;;  %1175 = vmatmul.mubr.msk.f32.gmra.mxu1 %vm517_vm0, %v659_v49  ;;  %669 = vst.msk [vmem:[#allocation2 + $0x8] sm:$0xf] %vm666_vm2, %v659_v49  ;;  %v1028_v48 = vld [vmem:[%s2062_s10 + $0x10] sm:$0xff] }
 0x334   :  { %819 = vmatpush1.msra.mxu1 %v677_v50  ;;  %854 = vmatprep.mubr.f32.mxu1 %v1412_v26  ;;  %v1026_v50 = vld [vmem:[%s2062_s10] sm:$0xff] }
 0x335   :  { %820 = vmatprep.subr.mxu1 %v674_v51  ;;  %670 = vst.msk [vmem:[#allocation2 + $0xc] sm:$0xf] %vm666_vm2, %v663_v52  ;;  %1341 = vmatprep.subr.mxu0 %v1412_v26 }
 0x336   :  { %821 = vmatpush1.msra.mxu1 %v673_v57  ;;  %1342 = vmatpush3.msra.mxu0 %v1028_v48 }
 0x337   :  { %1328 = vmatprep.subr.mxu1 %v1412_v26  ;;  %1176 = vmatmul.mubr.msk.f32.vlgmr.msra.gmra.mxu1 %vm517_vm0, %v658_v40 }
 0x338   :  { %1329 = vmatpush3.msra.mxu1 %v1844_v53  ;;  %860 = vmatprep.mubr.f32.mxu1 %v1412_v26  ;;  %v689_v53 = vlaneseq }
 0x339   :  { %1330 = vmatprep.subr.mxu1 %v1412_v26  ;;  %1343 = vmatprep.subr.mxu0 %v1412_v26 }
 0x33a   :  { %1331 = vmatpush3.msra.mxu1 %v1851_v54  ;;  %v1979_v54 = vshrl.u32 %v689_v53, 7 }
 0x33b   :  { %1332 = vmatprep.subr.mxu1 %v1412_v26  ;;  %1177 = vmatmul.mubr.msk.f32.gmra.mxu1 %vm517_vm0, %v659_v49  ;;  %v1027_v49 = vld [vmem:[%s2062_s10 + $0x8] sm:$0xff]  ;;  %s1389_s10 = scalar_lea.vmem %s1151_s30, 256 }
 0x33c   :  { %1333 = vmatpush3.msra.mxu1 %v1858_v55  ;;  %1336 = vmatprep.mubr.msk.f32.mxu1 %vm1413_vm1, %v1412_v26  ;;  %v691_v59 = vsub.s32 0, %v1979_v54  ;;  %v695_v55 = vsub.s32 1, %v1979_v54  ;;  %v703_v3 = vsub.s32 3, %v1979_v54  ;;  %p1390_p0 = scmp.ne.s32.totalorder %s1151_s30, %s1389_s10  ;;  %p1395_p2 = scmp.lt.s32.totalorder %s1389_s10, %s1389_s10 }
 0x33d   :  { %1334 = vmatprep.subr.mxu1 %v1412_v26  ;;  %1344 = vmatpush3.msra.mxu0 %v1027_v49 }
 0x33e   :  { %1335 = vmatpush3.msra.mxu1 %v1865_v56  ;;  %v692_v61 = vrot.slane %v687_v60, %v691_v59  ;;  %v696_v62 = vrot.slane %v687_v60, %v695_v55  ;;  %v699_v56 = vsub.s32 2, %v1979_v54  ;;  %v704_v12 = vrot.slane %v687_v60, %v703_v3  ;;  %1345 = vmatprep.subr.mxu0 %v1412_v26  ;;  %p1396_p3 = por %p1395_p2, %p1394_p1 }
 0x33f   :  { %1337 = vmatmul.mubr.msk.f32.vlgmr.msra.gmra.mxu1 %vm517_vm0, %v1178_v58  ;;  %1346 = vmatpush3.msra.mxu0 %v1026_v50 }
 0x340   :  { %v700_v11 = vrot.slane %v687_v60, %v699_v56  ;;  %p1397_p4 = pnand %p1396_p3, %p1390_p0 }
 0x3ef   :  { %v779_v63 = vpop.f32.mrf.mxu1 }
 0x3f0   :  { %v780_v1 = vadd.f32 %v779_v63, %v692_v61 }
 0x3f1   :  { %v781_v0 = vpop.f32.mrf.mxu1 }
 0x3f2   :  { %v782_v2 = vadd.f32 %v781_v0, %v696_v62 }
 0x3f3   :  { %v785_v4 = vpop.f32.mrf.mxu1 }
 0x3f4   :  { %v875_v5 = vcombine.low %v780_v1, %v782_v2  ;;  %v876_v7 = vcombine.high %v780_v1, %v782_v2  ;;  %v786_v9 = vadd.f32 %v785_v4, %v692_v61 }
 0x3f5   :  { %v787_v8 = vpop.f32.mrf.mxu1 }
 0x3f6   :  { %891 = vst [vmem:[%s2068_s16] sm:$0xff] %v875_v5  ;;  %893 = vst [vmem:[%s2068_s16 + $0x10] sm:$0xff] %v876_v7  ;;  %v788_v10 = vadd.f32 %v787_v8, %v696_v62 }
 0x3f7   :  { %v856_v13 = vpop.f32.mrf.mxu1 }
 0x3f8   :  { %v879_v14 = vcombine.low %v786_v9, %v788_v10  ;;  %v880_v15 = vcombine.high %v786_v9, %v788_v10  ;;  %v857_v17 = vadd.f32 %v856_v13, %v700_v11 }
 0x3f9   :  { %v858_v16 = vpop.f32.mrf.mxu1 }
 0x3fa   :  { %895 = vst [vmem:[%s2068_s16 + $0x20] sm:$0xff] %v879_v14  ;;  %897 = vst [vmem:[%s2068_s16 + $0x30] sm:$0xff] %v880_v15  ;;  %v859_v18 = vadd.f32 %v858_v16, %v704_v12 }
 0x3fb   :  { %v862_v19 = vpop.f32.mrf.mxu1 }
 0x3fc   :  { %v877_v20 = vcombine.low %v857_v17, %v859_v18  ;;  %v878_v21 = vcombine.high %v857_v17, %v859_v18  ;;  %v863_v23 = vadd.f32 %v862_v19, %v700_v11 }
 0x3fd   :  { %v864_v22 = vpop.f32.mrf.mxu1 }
 0x3fe   :  { %892 = vst [vmem:[%s2068_s16 + $0x8] sm:$0xff] %v877_v20  ;;  %894 = vst [vmem:[%s2068_s16 + $0x18] sm:$0xff] %v878_v21  ;;  %v865_v24 = vadd.f32 %v864_v22, %v704_v12 }
 0x3ff   :  { %v984_v25 = vpop.f32.mrf.mxu1 }
 0x400   :  { %v881_v27 = vcombine.low %v863_v23, %v865_v24  ;;  %v882_v28 = vcombine.high %v863_v23, %v865_v24  ;;  %v985_v29 = vadd.f32 %v1880_v43, %v984_v25 }
 0x401   :  { %v1338_v6 = vpop.f32.mrf.mxu1 }
 0x402   :  { %896 = vst [vmem:[%s2068_s16 + $0x28] sm:$0xff] %v881_v27  ;;  %898 = vst [vmem:[%s2068_s16 + $0x38] sm:$0xff] %v882_v28  ;;  %v988_v30 = vmul.f32 %v985_v29, %v985_v29 }
 0x404   :  { %v989_v31 = vmul.f32 %v988_v30, %v985_v29 }
 0x406   :  { %v990_v32 = vmul.f32 0.044715, %v989_v31 }
 0x408   :  { %v991_v33 = vadd.f32 %v990_v32, %v985_v29 }
 0x40a   :  { %v992_v34 = vmul.f32 0.7978846, %v991_v33 }
 0x40c   :  { %1385 = vtanh.f32 %v992_v34 }
 0x419   :  { %v1386_v36 = vpop.eup %1385 }
 0x41a   :  { %v994_v38 = vadd.f32 1.0, %v1386_v36 }
 0x41c   :  { %v995_v39 = vmul.f32 0.5, %v994_v38 }
 0x41e   :  { %v996_v40 = vmul.f32 %v995_v39, %v985_v29 }
 0x420   :  { %v997_v43 = vsel %vm666_vm2, %v996_v40, 0.0 }
 0x421   :  { %998 = vadd.xlane.f32.xlu1 %v997_v43 }
 0x4aa   :  { %v999_v41 = vpop.xlane.xlu1 %998 }
 0x4ab   :  { %v1000_v42 = vmul.f32 0.03125, %v999_v41 }
 0x4ad   :  { %v1001_v44 = vsub.f32 %v996_v40, %v1000_v42 }
 0x4af   :  { %v1002_v45 = vmul.f32 %v1001_v44, %v1001_v44 }
 0x4b1   :  { %v1003_v46 = vsel %vm666_vm2, %v1002_v45, 0.0 }
 0x4b2   :  { %1004 = vadd.xlane.f32.xlu0 %v1003_v46 }
 0x53b   :  { %v1005_v51 = vpop.xlane.xlu0 %1004 }
 0x53c   :  { %v1006_v52 = vmul.f32 0.03125, %v1005_v51 }
 0x53e   :  { %v1007_v57 = vadd.f32 1e-05, %v1006_v52 }
 0x540   :  { %1387 = vrsqrt.f32 %v1007_v57 }
 0x54d   :  { %v1388_v58 = vpop.eup %1387 }
 0x54e   :  { %v1009_v53 = vmul.f32 %v1388_v58, %v1001_v44 }
 0x550   :  { %v1017_v59 = vmul.f32 %v1922_v35, %v1009_v53 }
 0x552   :  { %v1025_v55 = vadd.f32 %v1927_v37, %v1017_v59 }
 0x554   :  { %1348 = vmatmul.mubr.msk.f32.vlgmr.msra.gmra.mxu0 %vm517_vm0, %v1025_v55 }
 0x555   :  { %1400 = shalt.err (!%p1397_p4)
}
 0x556   :  { %s1415_s0 = smov 64   ;;  %s1416_s5 = smov 4   ;;  %v1417_v26 = vmov 1966171168   ;;  %v1183_v60 = vld [vmem:[%s2063_s11] ss:$0 sm:$0xff] }
 0x557   :  { %1156 = dma.vmem_to_hbm [thread:$0]  %s1151_s30, 256, %s2067_s15, [#allocation3], %s1415_s0, %s1415_s0, %s1416_s5   ;;  %v1112_v35 = vunpack.c.l.s4 %v1417_v26 }
 0x559   :  { %v1113_v37 = vunpack.c.0.s8 %v1112_v35 }
 0x55b   :  { %v1116_v61 = vsub.s32 %v1113_v37, %v1979_v54 }
 0x614   :  { %v1106_v62 = vpop.f32.mrf.mxu0 }
 0x615   :  { %v1107_v63 = vadd.f32 %v1183_v60, %v1106_v62 }
 0x616   :  { %v1349_v0 = vpop.f32.mrf.mxu0 }
 0x617   :  { %v1117_v1 = vrot.slane %v1107_v63, %v1116_v61 }
 0x619   :  { %v1118_v2 = vcombine.high %v1117_v1, %v1117_v1  ;;  %v1125_v56 = vrot.slane %v1117_v1, %v1116_v61  ;;  %1185 = vst.sshfl [vmem:[%s2066_s14] sm:$0x1 pattern:$0x73625140] %v1117_v1 }
 0x61b   :  { %v1132_v3 = vrot.slane %v1118_v2, %v1116_v61  ;;  %v1133_v4 = vcombine.high %v1125_v56, %v1125_v56  ;;  %1186 = vst.sshfl [vmem:[%s2066_s14 + $0x1] sm:$0x1 pattern:$0x73625140] %v1118_v2 }
 0x61d   :  { %v1134_v5 = vcombine.high %v1132_v3, %v1132_v3  ;;  %1141 = vst [vmem:[%s2066_s14 + $0x2] sm:$0x1] %v1133_v4 }
 0x61f   :  { %1142 = vst [vmem:[%s2066_s14 + $0x3] sm:$0x1] %v1134_v5 }
 0x620   :  { %1409 = dma.done.wait [#allocation3], 256  }
 0x621   :  { %1410 = vsyncadd [#allocation3], 4294967040 }
 0x622   :  { %1166 = vsyncpa [#allocation3], 1 }

</bundles_post_ra>
